<compile_context>
chip_gen: v6e
topology: v6e:2x2x1
jax: 0.10.0
libtpu: 0.0.40
codegen_flags: <defaults>
</compile_context>

<pallas_src>
import functools

import numpy as np
import jax
import jax.numpy as jnp
from jax import lax
from jax.experimental import pallas as pl
from jax.experimental.pallas import tpu as pltpu

LATENT_DIMS = 16

# Compact channels-last row layouts (lane dim = width_pad * channels = 256):
#   h1 : ConvT1+ReLU output, 7 rows x (8 w_pad * 32 c) lanes   (w=7 is zero pad)
#   h2 : stage-2 even rows,  7 rows x (16 w_pad * 16 c) lanes  (w=14,15 zero pad)
H1_ROWS, H1_LANES = 7, 256          # 8 * 32
H2_LANES = 256                      # 16 * 16
OUT_HW = 28
OUT_PACK = 112                      # 4 output rows x 28 cols packed on lanes


# ---------------------------------------------------------------------------
# Fused decoder kernel: one grid step == one batch tile of `bt` images.
# ---------------------------------------------------------------------------
def _decoder_kernel(x_ref, m1_ref, b1_ref, a2_ref, b2_ref, m3_ref, b3_ref,
                    o_ref, h1_ref, e2_ref, *, bt):
    # ---- Stage 1: Linear(L->64) folded into ConvT(64,32,7) on 1x1 + ReLU -----
    # One (bt, L) @ (L, 7*256) matmul directly emits the 7 compact h1 rows.
    d1 = jnp.dot(x_ref[...], m1_ref[...], preferred_element_type=jnp.float32)
    d1 = jnp.maximum(d1 + b1_ref[...], 0.0)                       # (bt, 7*256)
    for r in range(H1_ROWS):
        h1_ref[:, r, :] = d1[:, r * H1_LANES:(r + 1) * H1_LANES]
    h1_ref[:, H1_ROWS, :] = jnp.zeros((bt, H1_LANES), jnp.float32)  # shift pad row

    # ---- Stage 2: ConvT(32,16,3,s2,p1,op1) + ReLU, split by row parity -------
    #   h2[2t]   = relu(h1[t]   @ A2[ky=1] + b2)
    #   h2[2t+1] = relu(h1[t]   @ A2[ky=2] + h1[t+1] @ A2[ky=0] + b2)
    rows_all = h1_ref[:, 0:H1_ROWS, :].reshape(bt * H1_ROWS, H1_LANES)
    rows_sft = h1_ref[:, 1:H1_ROWS + 1, :].reshape(bt * H1_ROWS, H1_LANES)
    even2 = jnp.maximum(
        jnp.dot(rows_all, a2_ref[1], preferred_element_type=jnp.float32)
        + b2_ref[...], 0.0)                                        # (bt*7, 256)
    odd2 = jnp.maximum(
        jnp.dot(rows_all, a2_ref[2], preferred_element_type=jnp.float32)
        + jnp.dot(rows_sft, a2_ref[0], preferred_element_type=jnp.float32)
        + b2_ref[...], 0.0)                                        # (bt*7, 256)
    e2 = even2.reshape(bt, H1_ROWS, H2_LANES)
    for t in range(H1_ROWS):
        e2_ref[:, t, :] = e2[:, t, :]
    e2_ref[:, H1_ROWS, :] = jnp.zeros((bt, H2_LANES), jnp.float32)  # shift pad row

    # ---- Stage 3: ConvT(16,1,3,s2,p1,op1) + Sigmoid ---------------------------
    # Output rows 4t..4t+3 of each image are packed side-by-side on lanes
    # (112 wide); the packed matrices fold the parity/shift structure.
    e2_sft = e2_ref[:, 1:H1_ROWS + 1, :].reshape(bt * H1_ROWS, H2_LANES)
    out = (jnp.dot(even2, m3_ref[0], preferred_element_type=jnp.float32)
           + jnp.dot(odd2, m3_ref[1], preferred_element_type=jnp.float32)
           + jnp.dot(e2_sft, m3_ref[2], preferred_element_type=jnp.float32))
    out = jax.nn.sigmoid(out + b3_ref[...])                        # (bt*7, 112)
    o_ref[...] = out.reshape(bt, H1_ROWS, OUT_PACK).astype(o_ref.dtype)


# ---------------------------------------------------------------------------
# Parameters (PyTorch-shaped), and one-time re-layout into kernel-ready form.
# ---------------------------------------------------------------------------
def init_params(key):
    ks = jax.random.split(key, 8)
    wl = jax.random.normal(ks[0], (64, LATENT_DIMS), jnp.float32) * 0.10   # Linear (out, in)
    bl = jax.random.normal(ks[1], (64,), jnp.float32) * 0.10
    wt1 = jax.random.normal(ks[2], (64, 32, 7, 7), jnp.float32) * 0.05     # ConvT (Cin,Cout,kH,kW)
    bt1 = jax.random.normal(ks[3], (32,), jnp.float32) * 0.05
    wt2 = jax.random.normal(ks[4], (32, 16, 3, 3), jnp.float32) * 0.05
    bt2 = jax.random.normal(ks[5], (16,), jnp.float32) * 0.05
    wt3 = jax.random.normal(ks[6], (16, 1, 3, 3), jnp.float32) * 0.05
    bt3 = jax.random.normal(ks[7], (1,), jnp.float32) * 0.05
    return (wl, bl, wt1, bt1, wt2, bt2, wt3, bt3)


def prepare_params(params):
    """One-time (hoisted) re-layout of PyTorch-shaped weights for the kernel.

    ConvTranspose2d scatter rule (stride 2, padding 1): out[Y] += in[y]*w[ky]
    with Y = 2*y + ky - 1 (same for width).  All parity/band structure below
    follows from that identity.
    """
    wl, bl, wt1, bt1, wt2, bt2, wt3, bt3 = [np.asarray(p, np.float32) for p in params]
    L = wl.shape[1]

    # --- Stage 1: Linear composed with ConvT1 (1x1 input => pure affine map) ---
    m1 = np.einsum("cl,coij->lijo", wl, wt1)                # (L, 7, 7, 32)
    m1p = np.zeros((L, 7, 8, 32), np.float32)               # pad width 7 -> 8
    m1p[:, :, :7, :] = m1
    m1p = m1p.reshape(L, 7 * H1_LANES)                      # (L, 1792)
    b1 = np.einsum("c,coij->ijo", bl, wt1) + bt1            # (7, 7, 32)
    b1p = np.zeros((7, 8, 32), np.float32)
    b1p[:, :7, :] = b1
    b1p = b1p.reshape(1, 7 * H1_LANES)                      # (1, 1792)

    # --- Stage 2: per-ky compact banded matrices (256 -> 256) ------------------
    # a2[ky][x*32+ci, X*16+co] = wt2[ci, co, ky, kx]  with X = 2x + kx - 1.
    a2 = np.zeros((3, 8, 32, 16, 16), np.float32)           # (ky, x_pad, ci, X_pad, co)
    for ky in range(3):
        for kx in range(3):
            for x in range(7):
                X = 2 * x + kx - 1
                if 0 <= X < 14:
                    a2[ky, x, :, X, :] += wt2[:, :, ky, kx]
    a2 = a2.reshape(3, H1_LANES, H2_LANES)                  # (3, 256, 256)
    b2p = np.zeros((16, 16), np.float32)
    b2p[:14, :] = bt2[None, :]
    b2p = b2p.reshape(1, H2_LANES)                          # (1, 256)

    # --- Stage 3: per-ky compact banded matrices (256 -> 28) -------------------
    m3 = np.zeros((3, 16, 16, OUT_HW), np.float32)          # (ky, x_pad, c, X)
    for ky in range(3):
        for kx in range(3):
            for x in range(14):
                X = 2 * x + kx - 1
                if 0 <= X < OUT_HW:
                    m3[ky, x, :, X] += wt3[:, 0, ky, kx]
    m3 = m3.reshape(3, H2_LANES, OUT_HW)
    # Pack 4 output rows (4t, 4t+1, 4t+2, 4t+3) onto 112 lanes:
    #   out[4t]   = even2[t] @ m3[1]
    #   out[4t+1] = even2[t] @ m3[2] + odd2[t]   @ m3[0]
    #   out[4t+2] = odd2[t]  @ m3[1]
    #   out[4t+3] = odd2[t]  @ m3[2] + even2[t+1] @ m3[0]
    E = np.zeros((H2_LANES, OUT_PACK), np.float32)          # applied to even2[t]
    O = np.zeros((H2_LANES, OUT_PACK), np.float32)          # applied to odd2[t]
    S = np.zeros((H2_LANES, OUT_PACK), np.float32)          # applied to even2[t+1]
    E[:, 0:28] = m3[1]
    E[:, 28:56] = m3[2]
    O[:, 28:56] = m3[0]
    O[:, 56:84] = m3[1]
    O[:, 84:112] = m3[2]
    S[:, 84:112] = m3[0]
    m3p = np.stack([E, O, S])                               # (3, 256, 112)
    b3p = np.full((1, OUT_PACK), bt3[0], np.float32)

    return tuple(jnp.asarray(a) for a in (m1p, b1p, a2, b2p, m3p, b3p))


# ---------------------------------------------------------------------------
# Forward pass: single fused pallas_call over batch tiles.
# ---------------------------------------------------------------------------
def decoder_forward(x, prepared, *, batch_tile=8):
    m1, b1, a2, b2, m3p, b3 = prepared
    B, L = x.shape
    bt = batch_tile if B >= batch_tile else B
    b_pad = ((B + bt - 1) // bt) * bt
    if b_pad != B:
        x = jnp.pad(x, ((0, b_pad - B), (0, 0)))
    grid = (b_pad // bt,)

    out = pl.pallas_call(
        functools.partial(_decoder_kernel, bt=bt),
        out_shape=jax.ShapeDtypeStruct((b_pad, H1_ROWS, OUT_PACK), jnp.float32),
        grid=grid,
        in_specs=[
            pl.BlockSpec((bt, L), lambda i: (i, 0)),
            pl.BlockSpec(m1.shape, lambda i: (0, 0)),
            pl.BlockSpec(b1.shape, lambda i: (0, 0)),
            pl.BlockSpec(a2.shape, lambda i: (0, 0, 0)),
            pl.BlockSpec(b2.shape, lambda i: (0, 0)),
            pl.BlockSpec(m3p.shape, lambda i: (0, 0, 0)),
            pl.BlockSpec(b3.shape, lambda i: (0, 0)),
        ],
        out_specs=pl.BlockSpec((bt, H1_ROWS, OUT_PACK), lambda i: (i, 0, 0)),
        scratch_shapes=[
            pltpu.VMEM((bt, H1_ROWS + 1, H1_LANES), jnp.float32),   # h1 slab (+zero row)
            pltpu.VMEM((bt, H1_ROWS + 1, H2_LANES), jnp.float32),   # even2 slab (+zero row)
        ],
        compiler_params=pltpu.CompilerParams(
            dimension_semantics=("parallel",),
            vmem_limit_bytes=32 * 1024 * 1024,
        ),
    )(x, m1, b1, a2, b2, m3p, b3)

    if b_pad != B:
        out = out[:B]
    # (B, 7, 112) is bit-identical (row-major) to (B, 28, 28): free reshape.
    return out.reshape(B, 1, OUT_HW, OUT_HW)


# ---------------------------------------------------------------------------
# Pure-JAX (XLA) reference for verification (mirrors the PyTorch module).
# ---------------------------------------------------------------------------
def reference_forward(x, params):
    wl, bl, wt1, bt1, wt2, bt2, wt3, bt3 = params
    h = x @ wl.T + bl                                                     # (B, 64)
    y = jnp.einsum("bc,cohw->bohw", h, wt1) + bt1[None, :, None, None]
    y = jnp.maximum(y, 0.0)                                               # (B,32,7,7)

    w2c = jnp.transpose(jnp.flip(wt2, (2, 3)), (1, 0, 2, 3))              # OIHW
    y = lax.conv_general_dilated(y, w2c, window_strides=(1, 1),
                                 padding=((1, 2), (1, 2)), lhs_dilation=(2, 2),
                                 dimension_numbers=("NCHW", "OIHW", "NCHW"))
    y = jnp.maximum(y + bt2[None, :, None, None], 0.0)                    # (B,16,14,14)

    w3c = jnp.transpose(jnp.flip(wt3, (2, 3)), (1, 0, 2, 3))
    y = lax.conv_general_dilated(y, w3c, window_strides=(1, 1),
                                 padding=((1, 2), (1, 2)), lhs_dilation=(2, 2),
                                 dimension_numbers=("NCHW", "OIHW", "NCHW"))
    return jax.nn.sigmoid(y + bt3[None, :, None, None])                   # (B,1,28,28)


if __name__ == "__main__":
    key = jax.random.PRNGKey(0)
    k_in, k_params = jax.random.split(key)

    B = 2
    x = jax.random.normal(k_in, (B, LATENT_DIMS), dtype=jnp.float32)
    params = init_params(k_params)
    prepared = prepare_params(params)          # one-time weight re-layout (hoisted)

    fwd = jax.jit(functools.partial(decoder_forward, batch_tile=8))
    out = jax.block_until_ready(fwd(x, prepared))
    assert out.shape == (B, 1, 28, 28), out.shape

    ref = reference_forward(x, params)
    max_err = float(jnp.max(jnp.abs(out - ref)))
    assert jnp.allclose(out, ref, atol=5e-4, rtol=5e-4), max_err

    print("KERNEL_OK")
</pallas_src>

<mosaic_0001>
module attributes {stable_mosaic.version = 11 : i64} {
  func.func @_decoder_kernel(%arg0: i32, %arg1: memref<2x16xf32, #tpu.memory_space<vmem>>, %arg2: memref<16x1792xf32, #tpu.memory_space<vmem>>, %arg3: memref<1x1792xf32, #tpu.memory_space<vmem>>, %arg4: memref<3x256x256xf32, #tpu.memory_space<vmem>>, %arg5: memref<1x256xf32, #tpu.memory_space<vmem>>, %arg6: memref<3x256x112xf32, #tpu.memory_space<vmem>>, %arg7: memref<1x112xf32, #tpu.memory_space<vmem>>, %arg8: memref<2x7x112xf32, #tpu.memory_space<vmem>>, %arg9: memref<2x8x256xf32, #tpu.memory_space<vmem>>, %arg10: memref<2x8x256xf32, #tpu.memory_space<vmem>>) attributes {dimension_semantics = [#tpu.dimension_semantics<parallel>], iteration_bounds = array<i64: 1>, scalar_prefetch = 0 : i64, scratch_operands = 2 : i64, tpu.core_type = #tpu.core_type<tc>, window_params = [{transform_indices = @transform_0, window_bounds = array<i64: 2, 16>}, {pipeline_mode = #tpu.pipeline_mode<synchronous>, transform_indices = @transform_1, window_bounds = array<i64: 16, 1792>}, {pipeline_mode = #tpu.pipeline_mode<synchronous>, transform_indices = @transform_2, window_bounds = array<i64: 1, 1792>}, {pipeline_mode = #tpu.pipeline_mode<synchronous>, transform_indices = @transform_3, window_bounds = array<i64: 3, 256, 256>}, {pipeline_mode = #tpu.pipeline_mode<synchronous>, transform_indices = @transform_4, window_bounds = array<i64: 1, 256>}, {pipeline_mode = #tpu.pipeline_mode<synchronous>, transform_indices = @transform_5, window_bounds = array<i64: 3, 256, 112>}, {pipeline_mode = #tpu.pipeline_mode<synchronous>, transform_indices = @transform_6, window_bounds = array<i64: 1, 112>}, {transform_indices = @transform_7, window_bounds = array<i64: 2, 7, 112>}]} {
    %c0 = arith.constant 0 : index
    %c0_0 = arith.constant 0 : index
    %0 = vector.load %arg1[%c0, %c0_0] : memref<2x16xf32, #tpu.memory_space<vmem>>, vector<2x16xf32>
    %c0_1 = arith.constant 0 : index
    %c0_2 = arith.constant 0 : index
    %1 = vector.load %arg2[%c0_1, %c0_2] : memref<16x1792xf32, #tpu.memory_space<vmem>>, vector<16x1792xf32>
    %cst = arith.constant dense<0.000000e+00> : vector<2x1792xf32>
    %2 = tpu.matmul %0, %1, %cst {dimension_numbers = #tpu.dot_dimension_numbers<[1], [0], [0], [1], [0, 0, 1, 1], [], []>} : vector<2x16xf32>, vector<16x1792xf32>, vector<2x1792xf32> -> vector<2x1792xf32>
    %c0_3 = arith.constant 0 : index
    %c0_4 = arith.constant 0 : index
    %3 = vector.load %arg3[%c0_3, %c0_4] : memref<1x1792xf32, #tpu.memory_space<vmem>>, vector<1x1792xf32>
    %4 = vector.broadcast %3 : vector<1x1792xf32> to vector<2x1792xf32>
    %5 = arith.addf %2, %4 : vector<2x1792xf32>
    %cst_5 = arith.constant 0.000000e+00 : f32
    %6 = vector.broadcast %cst_5 : f32 to vector<2x1792xf32>
    %7 = arith.maximumf %5, %6 : vector<2x1792xf32>
    %8 = vector.extract_strided_slice %7 {offsets = [0, 0], sizes = [2, 256], strides = [1, 1]} : vector<2x1792xf32> to vector<2x256xf32>
    %c0_6 = arith.constant 0 : index
    %c0_7 = arith.constant 0 : index
    %c0_8 = arith.constant 0 : index
    %9 = vector.load %arg9[%c0_6, %c0_7, %c0_8] : memref<2x8x256xf32, #tpu.memory_space<vmem>>, vector<2x1x256xf32>
    %10 = vector.shape_cast %9 : vector<2x1x256xf32> to vector<2x256xf32>
    %11 = vector.shape_cast %8 : vector<2x256xf32> to vector<2x1x256xf32>
    tpu.vector_store %arg9[%c0_6, %c0_7, %c0_8], %11 {strides = array<i32>} : memref<2x8x256xf32, #tpu.memory_space<vmem>>, vector<2x1x256xf32>,
    %12 = vector.extract_strided_slice %7 {offsets = [0, 256], sizes = [2, 256], strides = [1, 1]} : vector<2x1792xf32> to vector<2x256xf32>
    %c0_9 = arith.constant 0 : index
    %c1 = arith.constant 1 : index
    %c0_10 = arith.constant 0 : index
    %13 = vector.load %arg9[%c0_9, %c1, %c0_10] : memref<2x8x256xf32, #tpu.memory_space<vmem>>, vector<2x1x256xf32>
    %14 = vector.shape_cast %13 : vector<2x1x256xf32> to vector<2x256xf32>
    %15 = vector.shape_cast %12 : vector<2x256xf32> to vector<2x1x256xf32>
    tpu.vector_store %arg9[%c0_9, %c1, %c0_10], %15 {strides = array<i32>} : memref<2x8x256xf32, #tpu.memory_space<vmem>>, vector<2x1x256xf32>,
    %16 = vector.extract_strided_slice %7 {offsets = [0, 512], sizes = [2, 256], strides = [1, 1]} : vector<2x1792xf32> to vector<2x256xf32>
    %c0_11 = arith.constant 0 : index
    %c2 = arith.constant 2 : index
    %c0_12 = arith.constant 0 : index
    %17 = vector.load %arg9[%c0_11, %c2, %c0_12] : memref<2x8x256xf32, #tpu.memory_space<vmem>>, vector<2x1x256xf32>
    %18 = vector.shape_cast %17 : vector<2x1x256xf32> to vector<2x256xf32>
    %19 = vector.shape_cast %16 : vector<2x256xf32> to vector<2x1x256xf32>
    tpu.vector_store %arg9[%c0_11, %c2, %c0_12], %19 {strides = array<i32>} : memref<2x8x256xf32, #tpu.memory_space<vmem>>, vector<2x1x256xf32>,
    %20 = vector.extract_strided_slice %7 {offsets = [0, 768], sizes = [2, 256], strides = [1, 1]} : vector<2x1792xf32> to vector<2x256xf32>
    %c0_13 = arith.constant 0 : index
    %c3 = arith.constant 3 : index
    %c0_14 = arith.constant 0 : index
    %21 = vector.load %arg9[%c0_13, %c3, %c0_14] : memref<2x8x256xf32, #tpu.memory_space<vmem>>, vector<2x1x256xf32>
    %22 = vector.shape_cast %21 : vector<2x1x256xf32> to vector<2x256xf32>
    %23 = vector.shape_cast %20 : vector<2x256xf32> to vector<2x1x256xf32>
    tpu.vector_store %arg9[%c0_13, %c3, %c0_14], %23 {strides = array<i32>} : memref<2x8x256xf32, #tpu.memory_space<vmem>>, vector<2x1x256xf32>,
    %24 = vector.extract_strided_slice %7 {offsets = [0, 1024], sizes = [2, 256], strides = [1, 1]} : vector<2x1792xf32> to vector<2x256xf32>
    %c0_15 = arith.constant 0 : index
    %c4 = arith.constant 4 : index
    %c0_16 = arith.constant 0 : index
    %25 = vector.load %arg9[%c0_15, %c4, %c0_16] : memref<2x8x256xf32, #tpu.memory_space<vmem>>, vector<2x1x256xf32>
    %26 = vector.shape_cast %25 : vector<2x1x256xf32> to vector<2x256xf32>
    %27 = vector.shape_cast %24 : vector<2x256xf32> to vector<2x1x256xf32>
    tpu.vector_store %arg9[%c0_15, %c4, %c0_16], %27 {strides = array<i32>} : memref<2x8x256xf32, #tpu.memory_space<vmem>>, vector<2x1x256xf32>,
    %28 = vector.extract_strided_slice %7 {offsets = [0, 1280], sizes = [2, 256], strides = [1, 1]} : vector<2x1792xf32> to vector<2x256xf32>
    %c0_17 = arith.constant 0 : index
    %c5 = arith.constant 5 : index
    %c0_18 = arith.constant 0 : index
    %29 = vector.load %arg9[%c0_17, %c5, %c0_18] : memref<2x8x256xf32, #tpu.memory_space<vmem>>, vector<2x1x256xf32>
    %30 = vector.shape_cast %29 : vector<2x1x256xf32> to vector<2x256xf32>
    %31 = vector.shape_cast %28 : vector<2x256xf32> to vector<2x1x256xf32>
    tpu.vector_store %arg9[%c0_17, %c5, %c0_18], %31 {strides = array<i32>} : memref<2x8x256xf32, #tpu.memory_space<vmem>>, vector<2x1x256xf32>,
    %32 = vector.extract_strided_slice %7 {offsets = [0, 1536], sizes = [2, 256], strides = [1, 1]} : vector<2x1792xf32> to vector<2x256xf32>
    %c0_19 = arith.constant 0 : index
    %c6 = arith.constant 6 : index
    %c0_20 = arith.constant 0 : index
    %33 = vector.load %arg9[%c0_19, %c6, %c0_20] : memref<2x8x256xf32, #tpu.memory_space<vmem>>, vector<2x1x256xf32>
    %34 = vector.shape_cast %33 : vector<2x1x256xf32> to vector<2x256xf32>
    %35 = vector.shape_cast %32 : vector<2x256xf32> to vector<2x1x256xf32>
    tpu.vector_store %arg9[%c0_19, %c6, %c0_20], %35 {strides = array<i32>} : memref<2x8x256xf32, #tpu.memory_space<vmem>>, vector<2x1x256xf32>,
    %cst_21 = arith.constant 0.000000e+00 : f32
    %36 = vector.broadcast %cst_21 : f32 to vector<2x256xf32>
    %c0_22 = arith.constant 0 : index
    %c7 = arith.constant 7 : index
    %c0_23 = arith.constant 0 : index
    %37 = vector.load %arg9[%c0_22, %c7, %c0_23] : memref<2x8x256xf32, #tpu.memory_space<vmem>>, vector<2x1x256xf32>
    %38 = vector.shape_cast %37 : vector<2x1x256xf32> to vector<2x256xf32>
    %39 = vector.shape_cast %36 : vector<2x256xf32> to vector<2x1x256xf32>
    tpu.vector_store %arg9[%c0_22, %c7, %c0_23], %39 {strides = array<i32>} : memref<2x8x256xf32, #tpu.memory_space<vmem>>, vector<2x1x256xf32>,
    %c0_24 = arith.constant 0 : index
    %c0_25 = arith.constant 0 : index
    %c0_26 = arith.constant 0 : index
    %40 = vector.load %arg9[%c0_24, %c0_25, %c0_26] : memref<2x8x256xf32, #tpu.memory_space<vmem>>, vector<2x7x256xf32>
    %41 = vector.shape_cast %40 : vector<2x7x256xf32> to vector<14x256xf32>
    %c0_27 = arith.constant 0 : index
    %c1_28 = arith.constant 1 : index
    %c0_29 = arith.constant 0 : index
    %42 = vector.load %arg9[%c0_27, %c1_28, %c0_29] : memref<2x8x256xf32, #tpu.memory_space<vmem>>, vector<2x7x256xf32>
    %43 = vector.shape_cast %42 : vector<2x7x256xf32> to vector<14x256xf32>
    %c1_30 = arith.constant 1 : index
    %c0_31 = arith.constant 0 : index
    %c0_32 = arith.constant 0 : index
    %44 = vector.load %arg4[%c1_30, %c0_31, %c0_32] : memref<3x256x256xf32, #tpu.memory_space<vmem>>, vector<1x256x256xf32>
    %45 = vector.shape_cast %44 : vector<1x256x256xf32> to vector<256x256xf32>
    %cst_33 = arith.constant dense<0.000000e+00> : vector<14x256xf32>
    %46 = tpu.matmul %41, %45, %cst_33 {dimension_numbers = #tpu.dot_dimension_numbers<[1], [0], [0], [1], [0, 0, 1, 1], [], []>} : vector<14x256xf32>, vector<256x256xf32>, vector<14x256xf32> -> vector<14x256xf32>
    %c0_34 = arith.constant 0 : index
    %c0_35 = arith.constant 0 : index
    %47 = vector.load %arg5[%c0_34, %c0_35] : memref<1x256xf32, #tpu.memory_space<vmem>>, vector<1x256xf32>
    %48 = vector.broadcast %47 : vector<1x256xf32> to vector<14x256xf32>
    %49 = arith.addf %46, %48 : vector<14x256xf32>
    %cst_36 = arith.constant 0.000000e+00 : f32
    %50 = vector.broadcast %cst_36 : f32 to vector<14x256xf32>
    %51 = arith.maximumf %49, %50 : vector<14x256xf32>
    %c2_37 = arith.constant 2 : index
    %c0_38 = arith.constant 0 : index
    %c0_39 = arith.constant 0 : index
    %52 = vector.load %arg4[%c2_37, %c0_38, %c0_39] : memref<3x256x256xf32, #tpu.memory_space<vmem>>, vector<1x256x256xf32>
    %53 = vector.shape_cast %52 : vector<1x256x256xf32> to vector<256x256xf32>
    %cst_40 = arith.constant dense<0.000000e+00> : vector<14x256xf32>
    %54 = tpu.matmul %41, %53, %cst_40 {dimension_numbers = #tpu.dot_dimension_numbers<[1], [0], [0], [1], [0, 0, 1, 1], [], []>} : vector<14x256xf32>, vector<256x256xf32>, vector<14x256xf32> -> vector<14x256xf32>
    %c0_41 = arith.constant 0 : index
    %c0_42 = arith.constant 0 : index
    %c0_43 = arith.constant 0 : index
    %55 = vector.load %arg4[%c0_41, %c0_42, %c0_43] : memref<3x256x256xf32, #tpu.memory_space<vmem>>, vector<1x256x256xf32>
    %56 = vector.shape_cast %55 : vector<1x256x256xf32> to vector<256x256xf32>
    %cst_44 = arith.constant dense<0.000000e+00> : vector<14x256xf32>
    %57 = tpu.matmul %43, %56, %cst_44 {dimension_numbers = #tpu.dot_dimension_numbers<[1], [0], [0], [1], [0, 0, 1, 1], [], []>} : vector<14x256xf32>, vector<256x256xf32>, vector<14x256xf32> -> vector<14x256xf32>
    %58 = arith.addf %54, %57 : vector<14x256xf32>
    %c0_45 = arith.constant 0 : index
    %c0_46 = arith.constant 0 : index
    %59 = vector.load %arg5[%c0_45, %c0_46] : memref<1x256xf32, #tpu.memory_space<vmem>>, vector<1x256xf32>
    %60 = vector.broadcast %59 : vector<1x256xf32> to vector<14x256xf32>
    %61 = arith.addf %58, %60 : vector<14x256xf32>
    %cst_47 = arith.constant 0.000000e+00 : f32
    %62 = vector.broadcast %cst_47 : f32 to vector<14x256xf32>
    %63 = arith.maximumf %61, %62 : vector<14x256xf32>
    %64 = vector.shape_cast %51 : vector<14x256xf32> to vector<2x7x256xf32>
    %65 = vector.extract_strided_slice %64 {offsets = [0, 0, 0], sizes = [2, 1, 256], strides = [1, 1, 1]} : vector<2x7x256xf32> to vector<2x1x256xf32>
    %66 = vector.shape_cast %65 : vector<2x1x256xf32> to vector<2x256xf32>
    %c0_48 = arith.constant 0 : index
    %c0_49 = arith.constant 0 : index
    %c0_50 = arith.constant 0 : index
    %67 = vector.load %arg10[%c0_48, %c0_49, %c0_50] : memref<2x8x256xf32, #tpu.memory_space<vmem>>, vector<2x1x256xf32>
    %68 = vector.shape_cast %67 : vector<2x1x256xf32> to vector<2x256xf32>
    %69 = vector.shape_cast %66 : vector<2x256xf32> to vector<2x1x256xf32>
    tpu.vector_store %arg10[%c0_48, %c0_49, %c0_50], %69 {strides = array<i32>} : memref<2x8x256xf32, #tpu.memory_space<vmem>>, vector<2x1x256xf32>,
    %70 = vector.extract_strided_slice %64 {offsets = [0, 1, 0], sizes = [2, 1, 256], strides = [1, 1, 1]} : vector<2x7x256xf32> to vector<2x1x256xf32>
    %71 = vector.shape_cast %70 : vector<2x1x256xf32> to vector<2x256xf32>
    %c0_51 = arith.constant 0 : index
    %c1_52 = arith.constant 1 : index
    %c0_53 = arith.constant 0 : index
    %72 = vector.load %arg10[%c0_51, %c1_52, %c0_53] : memref<2x8x256xf32, #tpu.memory_space<vmem>>, vector<2x1x256xf32>
    %73 = vector.shape_cast %72 : vector<2x1x256xf32> to vector<2x256xf32>
    %74 = vector.shape_cast %71 : vector<2x256xf32> to vector<2x1x256xf32>
    tpu.vector_store %arg10[%c0_51, %c1_52, %c0_53], %74 {strides = array<i32>} : memref<2x8x256xf32, #tpu.memory_space<vmem>>, vector<2x1x256xf32>,
    %75 = vector.extract_strided_slice %64 {offsets = [0, 2, 0], sizes = [2, 1, 256], strides = [1, 1, 1]} : vector<2x7x256xf32> to vector<2x1x256xf32>
    %76 = vector.shape_cast %75 : vector<2x1x256xf32> to vector<2x256xf32>
    %c0_54 = arith.constant 0 : index
    %c2_55 = arith.constant 2 : index
    %c0_56 = arith.constant 0 : index
    %77 = vector.load %arg10[%c0_54, %c2_55, %c0_56] : memref<2x8x256xf32, #tpu.memory_space<vmem>>, vector<2x1x256xf32>
    %78 = vector.shape_cast %77 : vector<2x1x256xf32> to vector<2x256xf32>
    %79 = vector.shape_cast %76 : vector<2x256xf32> to vector<2x1x256xf32>
    tpu.vector_store %arg10[%c0_54, %c2_55, %c0_56], %79 {strides = array<i32>} : memref<2x8x256xf32, #tpu.memory_space<vmem>>, vector<2x1x256xf32>,
    %80 = vector.extract_strided_slice %64 {offsets = [0, 3, 0], sizes = [2, 1, 256], strides = [1, 1, 1]} : vector<2x7x256xf32> to vector<2x1x256xf32>
    %81 = vector.shape_cast %80 : vector<2x1x256xf32> to vector<2x256xf32>
    %c0_57 = arith.constant 0 : index
    %c3_58 = arith.constant 3 : index
    %c0_59 = arith.constant 0 : index
    %82 = vector.load %arg10[%c0_57, %c3_58, %c0_59] : memref<2x8x256xf32, #tpu.memory_space<vmem>>, vector<2x1x256xf32>
    %83 = vector.shape_cast %82 : vector<2x1x256xf32> to vector<2x256xf32>
    %84 = vector.shape_cast %81 : vector<2x256xf32> to vector<2x1x256xf32>
    tpu.vector_store %arg10[%c0_57, %c3_58, %c0_59], %84 {strides = array<i32>} : memref<2x8x256xf32, #tpu.memory_space<vmem>>, vector<2x1x256xf32>,
    %85 = vector.extract_strided_slice %64 {offsets = [0, 4, 0], sizes = [2, 1, 256], strides = [1, 1, 1]} : vector<2x7x256xf32> to vector<2x1x256xf32>
    %86 = vector.shape_cast %85 : vector<2x1x256xf32> to vector<2x256xf32>
    %c0_60 = arith.constant 0 : index
    %c4_61 = arith.constant 4 : index
    %c0_62 = arith.constant 0 : index
    %87 = vector.load %arg10[%c0_60, %c4_61, %c0_62] : memref<2x8x256xf32, #tpu.memory_space<vmem>>, vector<2x1x256xf32>
    %88 = vector.shape_cast %87 : vector<2x1x256xf32> to vector<2x256xf32>
    %89 = vector.shape_cast %86 : vector<2x256xf32> to vector<2x1x256xf32>
    tpu.vector_store %arg10[%c0_60, %c4_61, %c0_62], %89 {strides = array<i32>} : memref<2x8x256xf32, #tpu.memory_space<vmem>>, vector<2x1x256xf32>,
    %90 = vector.extract_strided_slice %64 {offsets = [0, 5, 0], sizes = [2, 1, 256], strides = [1, 1, 1]} : vector<2x7x256xf32> to vector<2x1x256xf32>
    %91 = vector.shape_cast %90 : vector<2x1x256xf32> to vector<2x256xf32>
    %c0_63 = arith.constant 0 : index
    %c5_64 = arith.constant 5 : index
    %c0_65 = arith.constant 0 : index
    %92 = vector.load %arg10[%c0_63, %c5_64, %c0_65] : memref<2x8x256xf32, #tpu.memory_space<vmem>>, vector<2x1x256xf32>
    %93 = vector.shape_cast %92 : vector<2x1x256xf32> to vector<2x256xf32>
    %94 = vector.shape_cast %91 : vector<2x256xf32> to vector<2x1x256xf32>
    tpu.vector_store %arg10[%c0_63, %c5_64, %c0_65], %94 {strides = array<i32>} : memref<2x8x256xf32, #tpu.memory_space<vmem>>, vector<2x1x256xf32>,
    %95 = vector.extract_strided_slice %64 {offsets = [0, 6, 0], sizes = [2, 1, 256], strides = [1, 1, 1]} : vector<2x7x256xf32> to vector<2x1x256xf32>
    %96 = vector.shape_cast %95 : vector<2x1x256xf32> to vector<2x256xf32>
    %c0_66 = arith.constant 0 : index
    %c6_67 = arith.constant 6 : index
    %c0_68 = arith.constant 0 : index
    %97 = vector.load %arg10[%c0_66, %c6_67, %c0_68] : memref<2x8x256xf32, #tpu.memory_space<vmem>>, vector<2x1x256xf32>
    %98 = vector.shape_cast %97 : vector<2x1x256xf32> to vector<2x256xf32>
    %99 = vector.shape_cast %96 : vector<2x256xf32> to vector<2x1x256xf32>
    tpu.vector_store %arg10[%c0_66, %c6_67, %c0_68], %99 {strides = array<i32>} : memref<2x8x256xf32, #tpu.memory_space<vmem>>, vector<2x1x256xf32>,
    %cst_69 = arith.constant 0.000000e+00 : f32
    %100 = vector.broadcast %cst_69 : f32 to vector<2x256xf32>
    %c0_70 = arith.constant 0 : index
    %c7_71 = arith.constant 7 : index
    %c0_72 = arith.constant 0 : index
    %101 = vector.load %arg10[%c0_70, %c7_71, %c0_72] : memref<2x8x256xf32, #tpu.memory_space<vmem>>, vector<2x1x256xf32>
    %102 = vector.shape_cast %101 : vector<2x1x256xf32> to vector<2x256xf32>
    %103 = vector.shape_cast %100 : vector<2x256xf32> to vector<2x1x256xf32>
    tpu.vector_store %arg10[%c0_70, %c7_71, %c0_72], %103 {strides = array<i32>} : memref<2x8x256xf32, #tpu.memory_space<vmem>>, vector<2x1x256xf32>,
    %c0_73 = arith.constant 0 : index
    %c1_74 = arith.constant 1 : index
    %c0_75 = arith.constant 0 : index
    %104 = vector.load %arg10[%c0_73, %c1_74, %c0_75] : memref<2x8x256xf32, #tpu.memory_space<vmem>>, vector<2x7x256xf32>
    %105 = vector.shape_cast %104 : vector<2x7x256xf32> to vector<14x256xf32>
    %c0_76 = arith.constant 0 : index
    %c0_77 = arith.constant 0 : index
    %c0_78 = arith.constant 0 : index
    %106 = vector.load %arg6[%c0_76, %c0_77, %c0_78] : memref<3x256x112xf32, #tpu.memory_space<vmem>>, vector<1x256x112xf32>
    %107 = vector.shape_cast %106 : vector<1x256x112xf32> to vector<256x112xf32>
    %cst_79 = arith.constant dense<0.000000e+00> : vector<14x112xf32>
    %108 = tpu.matmul %51, %107, %cst_79 {dimension_numbers = #tpu.dot_dimension_numbers<[1], [0], [0], [1], [0, 0, 1, 1], [], []>} : vector<14x256xf32>, vector<256x112xf32>, vector<14x112xf32> -> vector<14x112xf32>
    %c1_80 = arith.constant 1 : index
    %c0_81 = arith.constant 0 : index
    %c0_82 = arith.constant 0 : index
    %109 = vector.load %arg6[%c1_80, %c0_81, %c0_82] : memref<3x256x112xf32, #tpu.memory_space<vmem>>, vector<1x256x112xf32>
    %110 = vector.shape_cast %109 : vector<1x256x112xf32> to vector<256x112xf32>
    %cst_83 = arith.constant dense<0.000000e+00> : vector<14x112xf32>
    %111 = tpu.matmul %63, %110, %cst_83 {dimension_numbers = #tpu.dot_dimension_numbers<[1], [0], [0], [1], [0, 0, 1, 1], [], []>} : vector<14x256xf32>, vector<256x112xf32>, vector<14x112xf32> -> vector<14x112xf32>
    %112 = arith.addf %108, %111 : vector<14x112xf32>
    %c2_84 = arith.constant 2 : index
    %c0_85 = arith.constant 0 : index
    %c0_86 = arith.constant 0 : index
    %113 = vector.load %arg6[%c2_84, %c0_85, %c0_86] : memref<3x256x112xf32, #tpu.memory_space<vmem>>, vector<1x256x112xf32>
    %114 = vector.shape_cast %113 : vector<1x256x112xf32> to vector<256x112xf32>
    %cst_87 = arith.constant dense<0.000000e+00> : vector<14x112xf32>
    %115 = tpu.matmul %105, %114, %cst_87 {dimension_numbers = #tpu.dot_dimension_numbers<[1], [0], [0], [1], [0, 0, 1, 1], [], []>} : vector<14x256xf32>, vector<256x112xf32>, vector<14x112xf32> -> vector<14x112xf32>
    %116 = arith.addf %112, %115 : vector<14x112xf32>
    %c0_88 = arith.constant 0 : index
    %c0_89 = arith.constant 0 : index
    %117 = vector.load %arg7[%c0_88, %c0_89] : memref<1x112xf32, #tpu.memory_space<vmem>>, vector<1x112xf32>
    %118 = vector.broadcast %117 : vector<1x112xf32> to vector<14x112xf32>
    %119 = arith.addf %116, %118 : vector<14x112xf32>
    %120 = arith.negf %119 : vector<14x112xf32>
    %121 = math.exp %120 : vector<14x112xf32>
    %cst_90 = arith.constant 1.000000e+00 : f32
    %122 = vector.broadcast %cst_90 : f32 to vector<14x112xf32>
    %123 = arith.addf %122, %121 : vector<14x112xf32>
    %124 = arith.divf %122, %123 : vector<14x112xf32>
    %125 = vector.shape_cast %124 : vector<14x112xf32> to vector<2x7x112xf32>
    %c0_91 = arith.constant 0 : index
    %c0_92 = arith.constant 0 : index
    %c0_93 = arith.constant 0 : index
    %126 = vector.load %arg8[%c0_91, %c0_92, %c0_93] : memref<2x7x112xf32, #tpu.memory_space<vmem>>, vector<2x7x112xf32>
    tpu.vector_store %arg8[%c0_91, %c0_92, %c0_93], %125 {strides = array<i32>} : memref<2x7x112xf32, #tpu.memory_space<vmem>>, vector<2x7x112xf32>,
    return
  }
  func.func @transform_0(%arg0: i32) -> (i32, i32) {
    %c0_i32 = arith.constant 0 : i32
    %c0_i32_0 = arith.constant 0 : i32
    return %arg0, %c0_i32 : i32, i32
  }
  func.func @transform_1(%arg0: i32) -> (i32, i32) {
    %c0_i32 = arith.constant 0 : i32
    %c0_i32_0 = arith.constant 0 : i32
    %c0_i32_1 = arith.constant 0 : i32
    return %c0_i32, %c0_i32_0 : i32, i32
  }
  func.func @transform_2(%arg0: i32) -> (i32, i32) {
    %c0_i32 = arith.constant 0 : i32
    %c0_i32_0 = arith.constant 0 : i32
    %c0_i32_1 = arith.constant 0 : i32
    return %c0_i32, %c0_i32_0 : i32, i32
  }
  func.func @transform_3(%arg0: i32) -> (i32, i32, i32) {
    %c0_i32 = arith.constant 0 : i32
    %c0_i32_0 = arith.constant 0 : i32
    %c0_i32_1 = arith.constant 0 : i32
    %c0_i32_2 = arith.constant 0 : i32
    return %c0_i32, %c0_i32_0, %c0_i32_1 : i32, i32, i32
  }
  func.func @transform_4(%arg0: i32) -> (i32, i32) {
    %c0_i32 = arith.constant 0 : i32
    %c0_i32_0 = arith.constant 0 : i32
    %c0_i32_1 = arith.constant 0 : i32
    return %c0_i32, %c0_i32_0 : i32, i32
  }
  func.func @transform_5(%arg0: i32) -> (i32, i32, i32) {
    %c0_i32 = arith.constant 0 : i32
    %c0_i32_0 = arith.constant 0 : i32
    %c0_i32_1 = arith.constant 0 : i32
    %c0_i32_2 = arith.constant 0 : i32
    return %c0_i32, %c0_i32_0, %c0_i32_1 : i32, i32, i32
  }
  func.func @transform_6(%arg0: i32) -> (i32, i32) {
    %c0_i32 = arith.constant 0 : i32
    %c0_i32_0 = arith.constant 0 : i32
    %c0_i32_1 = arith.constant 0 : i32
    return %c0_i32, %c0_i32_0 : i32, i32
  }
  func.func @transform_7(%arg0: i32) -> (i32, i32, i32) {
    %c0_i32 = arith.constant 0 : i32
    %c0_i32_0 = arith.constant 0 : i32
    %c0_i32_1 = arith.constant 0 : i32
    return %arg0, %c0_i32, %c0_i32_0 : i32, i32, i32
  }
}

</mosaic_0001>

<bundles_post_ra>
// kernel: decoder_forward.1
= control target key start
LH: loop header
LB: loop body
LE: loop exit
PB: predicated region body
PF: predicated region fallthrough
CT: control target
= control target key end

     0   :  { %12 = vsyncpa [#allocation5], 0  ;;  %s3010_s24 = smov [#allocation4]   ;;  %s3770_s0 = inlined_call_operand.vmem [shape: f32[2,16], index: 0, kind: input, shape index: {}]   ;;  %s3771_s1 = inlined_call_operand.vmem [shape: f32[16,1792], index: 1, kind: input, shape index: {}]   ;;  %s3772_s2 = inlined_call_operand.vmem [shape: f32[1,1792], index: 2, kind: input, shape index: {}]   ;;  %s3773_s3 = inlined_call_operand.hbm [shape: f32[3,256,256], index: 3, kind: input, shape index: {}]   ;;  %s3774_s4 = inlined_call_operand.vmem [shape: f32[1,256], index: 4, kind: input, shape index: {}]   ;;  %s3775_s5 = inlined_call_operand.vmem [shape: f32[3,256,112], index: 5, kind: input, shape index: {}]   ;;  %s3776_s6 = inlined_call_operand.vmem [shape: f32[1,112], index: 6, kind: input, shape index: {}]   ;;  %s3777_s7 = inlined_call_operand.vmem [shape: f32[2,7,112], index: 7, kind: output, shape index: {}]  }
   0x1   :  { %s24_s25 = sshll.u32 %s3010_s24, 4  ;;  %s25_s25 = int_to_ptr.vmem [resolvable:$true] %s24_s25 }
   0x2   :  { %s2996_s26 = scalar_lea.vmem %s25_s25, 24576  ;;  %p3001_p1 = scmp.lt.s32.totalorder %s25_s25, %s25_s25 }
   0x3   :  { %p2997_p0 = scmp.ne.s32.totalorder %s25_s25, %s2996_s26  ;;  %p3002_p2 = scmp.lt.s32.totalorder %s2996_s26, %s2996_s26 }
   0x5   :  { %p3003_p3 = por %p3002_p2, %p3001_p1 }
   0x7   :  { %p3004_p4 = pnand %p3003_p3, %p2997_p0 }
   0x9   :  { %3007 = shalt.err (!%p3004_p4)
}
   0xa   :  { %s3011_s27 = smov 256   ;;  %s3012_s28 = smov 16  }
   0xb   :  { %30 = dma.hbm_to_vmem [thread:$0]  %s3773_s3, 24576, %s25_s25, [#allocation5], %s3011_s27, %s3011_s27, %s3012_s28  }
   0xc   :  { %3008 = dma.done.wait [#allocation5], 24576  }
   0xd   :  { %3009 = vsyncadd [#allocation5], 4294942720  ;;  %v3013_v0 = vmov 0.0   ;;  %v56_v1 = vld [vmem:[%s3771_s1 + $0x78] sm:$0xff]  ;;  %v55_v2 = vld [vmem:[%s3771_s1 + $0x70] sm:$0xff]  ;;  %vm143_vm0 = vcmask 130048   ;;  %v73_v35 = vlaneseq }
   0xe   :  { %211 = vmatprep.mubr.f32.mxu0 %v3013_v0  ;;  %v42_v3 = vld [vmem:[%s3771_s1 + $0x8] sm:$0xff]  ;;  %175 = vmatprep.subr.mxu0 %v56_v1  ;;  %v41_v4 = vld [vmem:[%s3771_s1] sm:$0xff]  ;;  %v44_v8 = vld [vmem:[%s3771_s1 + $0x18] sm:$0xff]  ;;  %vm2755_vm2 = vcmask 915456  }
   0xf   :  { %176 = vmatpush1.msra.mxu0 %v55_v2  ;;  %v3074_v5 = vld [vmem:[%s3770_s0] sm:$0x3]  ;;  %v58_v6 = vld [vmem:[%s3771_s1 + $0x88] sm:$0xff]  ;;  %v43_v9 = vld [vmem:[%s3771_s1 + $0x10] sm:$0xff]  ;;  %vm3169_vm1 = vcmp.lt.s32.totalorder %v73_v35, 256 }
  0x10   :  { %177 = vmatprep.subr.mxu0 %v42_v3  ;;  %v57_v7 = vld [vmem:[%s3771_s1 + $0x80] sm:$0xff]  ;;  %v60_v10 = vld [vmem:[%s3771_s1 + $0x98] sm:$0xff]  ;;  %v59_v11 = vld [vmem:[%s3771_s1 + $0x90] sm:$0xff]  ;;  %893 = vst.msk [vmem:[#allocation2 + $0x7] ss:$8 sm:$0x3] %vm3169_vm1, %v3013_v0 }
  0x11   :  { %178 = vmatpush1.msra.mxu0 %v41_v4  ;;  %v46_v12 = vld [vmem:[%s3771_s1 + $0x28] sm:$0xff]  ;;  %v45_v13 = vld [vmem:[%s3771_s1 + $0x20] sm:$0xff]  ;;  %v1144_v14 = vld [vmem:[#allocation4 + $0x2f8] sm:$0xff]  ;;  %896 = vst.msk [vmem:[#allocation2 + $0x17] ss:$8 sm:$0x3] %vm3169_vm1, %v3013_v0 }
  0x12   :  { %2763 = vmatmul.mubr.msk.f32.vlgmr.msra.gmra.mxu0 %vm143_vm0, %v3074_v5  ;;  %246 = vmatprep.subr.mxu0 %v58_v6  ;;  %v62_v15 = vld [vmem:[%s3771_s1 + $0xa8] sm:$0xff]  ;;  %v61_v16 = vld [vmem:[%s3771_s1 + $0xa0] sm:$0xff]  ;;  %v48_v17 = vld [vmem:[%s3771_s1 + $0x38] sm:$0xff]  ;;  %1973 = vst.msk [vmem:[#allocation3 + $0x7] ss:$8 sm:$0x3] %vm3169_vm1, %v3013_v0 }
  0x13   :  { %247 = vmatpush1.msra.mxu0 %v57_v7  ;;  %282 = vmatprep.mubr.f32.mxu0 %v3013_v0  ;;  %v47_v18 = vld [vmem:[%s3771_s1 + $0x30] sm:$0xff]  ;;  %v64_v19 = vld [vmem:[%s3771_s1 + $0xb8] sm:$0xff]  ;;  %v50_v21 = vld [vmem:[%s3771_s1 + $0x48] sm:$0xff]  ;;  %1976 = vst.msk [vmem:[#allocation3 + $0x17] ss:$8 sm:$0x3] %vm3169_vm1, %v3013_v0 }
  0x14   :  { %248 = vmatprep.subr.mxu0 %v44_v8  ;;  %1316 = vmatprep.subr.mxu1 %v1144_v14  ;;  %v63_v20 = vld [vmem:[%s3771_s1 + $0xb0] sm:$0xff]  ;;  %v49_v22 = vld [vmem:[%s3771_s1 + $0x40] sm:$0xff]  ;;  %v66_v23 = vld [vmem:[%s3771_s1 + $0xc8] sm:$0xff] }
  0x15   :  { %249 = vmatpush1.msra.mxu0 %v43_v9  ;;  %v65_v24 = vld [vmem:[%s3771_s1 + $0xc0] sm:$0xff]  ;;  %v52_v25 = vld [vmem:[%s3771_s1 + $0x58] sm:$0xff]  ;;  %v51_v26 = vld [vmem:[%s3771_s1 + $0x50] sm:$0xff] }
  0x16   :  { %2764 = vmatmul.mubr.msk.f32.vlgmr.msra.gmra.mxu0 %vm143_vm0, %v3074_v5  ;;  %317 = vmatprep.subr.mxu0 %v60_v10  ;;  %v68_v27 = vld [vmem:[%s3771_s1 + $0xd8] sm:$0xff]  ;;  %v67_v28 = vld [vmem:[%s3771_s1 + $0xd0] sm:$0xff]  ;;  %v54_v29 = vld [vmem:[%s3771_s1 + $0x68] sm:$0xff] }
  0x17   :  { %318 = vmatpush1.msra.mxu0 %v59_v11  ;;  %353 = vmatprep.mubr.f32.mxu0 %v3013_v0  ;;  %v53_v30 = vld [vmem:[%s3771_s1 + $0x60] sm:$0xff]  ;;  %v1143_v31 = vld [vmem:[#allocation4 + $0x2f0] sm:$0xff]  ;;  %v1142_v32 = vld [vmem:[#allocation4 + $0x2e8] sm:$0xff] }
  0x18   :  { %319 = vmatprep.subr.mxu0 %v46_v12  ;;  %1317 = vmatpush1.msra.mxu1 %v1143_v31  ;;  %v1141_v33 = vld [vmem:[#allocation4 + $0x2e0] sm:$0xff]  ;;  %v1493_v34 = vld [vmem:[#allocation4 + $0xf8] sm:$0xff]  ;;  %v1492_v37 = vld [vmem:[#allocation4 + $0xf0] sm:$0xff] }
  0x19   :  { %320 = vmatpush1.msra.mxu0 %v45_v13  ;;  %1318 = vmatprep.subr.mxu1 %v1142_v32  ;;  %v1140_v36 = vld [vmem:[#allocation4 + $0x2d8] sm:$0xff]  ;;  %v1139_v38 = vld [vmem:[#allocation4 + $0x2d0] sm:$0xff]  ;;  %v1491_v39 = vld [vmem:[#allocation4 + $0xe8] sm:$0xff] }
  0x1a   :  { %2765 = vmatmul.mubr.msk.f32.vlgmr.msra.gmra.mxu0 %vm143_vm0, %v3074_v5  ;;  %388 = vmatprep.subr.mxu0 %v62_v15  ;;  %v1138_v41 = vld [vmem:[#allocation4 + $0x2c8] sm:$0xff]  ;;  %v1490_v42 = vld [vmem:[#allocation4 + $0xe0] sm:$0xff]  ;;  %v1489_v44 = vld [vmem:[#allocation4 + $0xd8] sm:$0xff] }
  0x1b   :  { %389 = vmatpush1.msra.mxu0 %v61_v16  ;;  %424 = vmatprep.mubr.f32.mxu0 %v3013_v0  ;;  %v1137_v43 = vld [vmem:[#allocation4 + $0x2c0] sm:$0xff]  ;;  %v1136_v45 = vld [vmem:[#allocation4 + $0x2b8] sm:$0xff]  ;;  %v1488_v46 = vld [vmem:[#allocation4 + $0xd0] sm:$0xff] }
  0x1c   :  { %390 = vmatprep.subr.mxu0 %v48_v17  ;;  %1319 = vmatpush1.msra.mxu1 %v1141_v33  ;;  %v1135_v47 = vld [vmem:[#allocation4 + $0x2b0] sm:$0xff]  ;;  %v1487_v48 = vld [vmem:[#allocation4 + $0xc8] sm:$0xff]  ;;  %v1486_v50 = vld [vmem:[#allocation4 + $0xc0] sm:$0xff] }
  0x1d   :  { %391 = vmatpush1.msra.mxu0 %v47_v18  ;;  %1320 = vmatprep.subr.mxu1 %v1140_v36  ;;  %v1134_v49 = vld [vmem:[#allocation4 + $0x2a8] sm:$0xff]  ;;  %v1133_v51 = vld [vmem:[#allocation4 + $0x2a0] sm:$0xff]  ;;  %v1485_v52 = vld [vmem:[#allocation4 + $0xb8] sm:$0xff] }
  0x1e   :  { %2766 = vmatmul.mubr.msk.f32.vlgmr.msra.gmra.mxu0 %vm143_vm0, %v3074_v5  ;;  %459 = vmatprep.subr.mxu0 %v64_v19  ;;  %v1132_v53 = vld [vmem:[#allocation4 + $0x298] sm:$0xff]  ;;  %v1484_v54 = vld [vmem:[#allocation4 + $0xb0] sm:$0xff]  ;;  %v1483_v56 = vld [vmem:[#allocation4 + $0xa8] sm:$0xff] }
  0x1f   :  { %460 = vmatpush1.msra.mxu0 %v63_v20  ;;  %495 = vmatprep.mubr.f32.mxu0 %v3013_v0  ;;  %v1131_v55 = vld [vmem:[#allocation4 + $0x290] sm:$0xff]  ;;  %v1130_v57 = vld [vmem:[#allocation4 + $0x288] sm:$0xff]  ;;  %v1482_v58 = vld [vmem:[#allocation4 + $0xa0] sm:$0xff] }
  0x20   :  { %461 = vmatprep.subr.mxu0 %v50_v21  ;;  %1321 = vmatpush1.msra.mxu1 %v1139_v38  ;;  %v1129_v59 = vld [vmem:[#allocation4 + $0x280] sm:$0xff]  ;;  %v1481_v60 = vld [vmem:[#allocation4 + $0x98] sm:$0xff]  ;;  %v1480_v62 = vld [vmem:[#allocation4 + $0x90] sm:$0xff] }
  0x21   :  { %462 = vmatpush1.msra.mxu0 %v49_v22  ;;  %1322 = vmatprep.subr.mxu1 %v1138_v41  ;;  %v1128_v61 = vld [vmem:[#allocation4 + $0x278] sm:$0xff]  ;;  %v1127_v63 = vld [vmem:[#allocation4 + $0x270] sm:$0xff]  ;;  %v1126_v1 = vld [vmem:[#allocation4 + $0x268] sm:$0xff] }
  0x22   :  { %2767 = vmatmul.mubr.msk.f32.vlgmr.msra.gmra.mxu0 %vm143_vm0, %v3074_v5  ;;  %530 = vmatprep.subr.mxu0 %v66_v23  ;;  %v1478_v2 = vld [vmem:[#allocation4 + $0x80] sm:$0xff]  ;;  %v1477_v4 = vld [vmem:[#allocation4 + $0x78] sm:$0xff]  ;;  %v1476_v6 = vld [vmem:[#allocation4 + $0x70] sm:$0xff] }
  0x23   :  { %531 = vmatpush1.msra.mxu0 %v65_v24  ;;  %566 = vmatprep.mubr.f32.mxu0 %v3013_v0  ;;  %v1125_v3 = vld [vmem:[#allocation4 + $0x260] sm:$0xff]  ;;  %v1123_v7 = vld [vmem:[#allocation4 + $0x250] sm:$0xff]  ;;  %v1475_v8 = vld [vmem:[#allocation4 + $0x68] sm:$0xff] }
  0x24   :  { %532 = vmatprep.subr.mxu0 %v52_v25  ;;  %1323 = vmatpush1.msra.mxu1 %v1137_v43  ;;  %v1122_v9 = vld [vmem:[#allocation4 + $0x248] sm:$0xff]  ;;  %v1474_v10 = vld [vmem:[#allocation4 + $0x60] sm:$0xff]  ;;  %v1473_v12 = vld [vmem:[#allocation4 + $0x58] sm:$0xff] }
  0x25   :  { %533 = vmatpush1.msra.mxu0 %v51_v26  ;;  %1324 = vmatprep.subr.mxu1 %v1136_v45  ;;  %v1121_v11 = vld [vmem:[#allocation4 + $0x240] sm:$0xff]  ;;  %v1120_v13 = vld [vmem:[#allocation4 + $0x238] sm:$0xff]  ;;  %v1472_v14 = vld [vmem:[#allocation4 + $0x50] sm:$0xff] }
  0x26   :  { %2768 = vmatmul.mubr.msk.f32.vlgmr.msra.gmra.mxu0 %vm143_vm0, %v3074_v5  ;;  %601 = vmatprep.subr.mxu0 %v68_v27  ;;  %v1119_v15 = vld [vmem:[#allocation4 + $0x230] sm:$0xff]  ;;  %v1471_v16 = vld [vmem:[#allocation4 + $0x48] sm:$0xff]  ;;  %v1470_v18 = vld [vmem:[#allocation4 + $0x40] sm:$0xff] }
  0x27   :  { %602 = vmatpush1.msra.mxu0 %v67_v28  ;;  %637 = vmatprep.mubr.f32.mxu0 %v3013_v0  ;;  %v1479_v0 = vld [vmem:[#allocation4 + $0x88] sm:$0xff]  ;;  %v1117_v19 = vld [vmem:[#allocation4 + $0x220] sm:$0xff]  ;;  %v1469_v20 = vld [vmem:[#allocation4 + $0x38] sm:$0xff] }
  0x28   :  { %603 = vmatprep.subr.mxu0 %v54_v29  ;;  %1325 = vmatpush1.msra.mxu1 %v1135_v47  ;;  %v1118_v17 = vld [vmem:[#allocation4 + $0x228] sm:$0xff]  ;;  %v1116_v21 = vld [vmem:[#allocation4 + $0x218] sm:$0xff]  ;;  %v1468_v22 = vld [vmem:[#allocation4 + $0x30] sm:$0xff] }
  0x29   :  { %604 = vmatpush1.msra.mxu0 %v53_v30  ;;  %1326 = vmatprep.subr.mxu1 %v1134_v49  ;;  %v1115_v23 = vld [vmem:[#allocation4 + $0x210] sm:$0xff]  ;;  %v1467_v24 = vld [vmem:[#allocation4 + $0x28] sm:$0xff]  ;;  %v1466_v26 = vld [vmem:[#allocation4 + $0x20] sm:$0xff] }
  0x2a   :  { %2769 = vmatmul.mubr.msk.f32.vlgmr.msra.gmra.mxu0 %vm143_vm0, %v3074_v5  ;;  %1653 = vmatprep.subr.mxu0 %v1493_v34  ;;  %v1124_v5 = vld [vmem:[#allocation4 + $0x258] sm:$0xff]  ;;  %v1114_v25 = vld [vmem:[#allocation4 + $0x208] sm:$0xff]  ;;  %v1113_v27 = vld [vmem:[#allocation4 + $0x200] sm:$0xff] }
  0x2b   :  { %1654 = vmatpush1.msra.mxu0 %v1492_v37  ;;  %1327 = vmatpush1.msra.mxu1 %v1133_v51  ;;  %v1465_v28 = vld [vmem:[#allocation4 + $0x18] sm:$0xff]  ;;  %v1464_v30 = vld [vmem:[#allocation4 + $0x10] sm:$0xff]  ;;  %v1463_v32 = vld [vmem:[#allocation4 + $0x8] sm:$0xff] }
  0x2c   :  { %1655 = vmatprep.subr.mxu0 %v1491_v39  ;;  %1328 = vmatprep.subr.mxu1 %v1132_v53  ;;  %v1176_v29 = vld [vmem:[#allocation4 + $0x3f8] sm:$0xff]  ;;  %v1175_v31 = vld [vmem:[#allocation4 + $0x3f0] sm:$0xff]  ;;  %v1174_v33 = vld [vmem:[#allocation4 + $0x3e8] sm:$0xff] }
  0x2d   :  { %1656 = vmatpush1.msra.mxu0 %v1490_v42  ;;  %1329 = vmatpush1.msra.mxu1 %v1131_v55  ;;  %v1462_v34 = vld [vmem:[#allocation4] sm:$0xff]  ;;  %v1525_v37 = vld [vmem:[#allocation4 + $0x1f8] sm:$0xff]  ;;  %v1524_v39 = vld [vmem:[#allocation4 + $0x1f0] sm:$0xff] }
  0x2e   :  { %1657 = vmatprep.subr.mxu0 %v1489_v44  ;;  %1330 = vmatprep.subr.mxu1 %v1130_v57  ;;  %v1173_v36 = vld [vmem:[#allocation4 + $0x3e0] sm:$0xff]  ;;  %v1172_v38 = vld [vmem:[#allocation4 + $0x3d8] sm:$0xff]  ;;  %v1171_v41 = vld [vmem:[#allocation4 + $0x3d0] sm:$0xff] }
  0x2f   :  { %1658 = vmatpush1.msra.mxu0 %v1488_v46  ;;  %1331 = vmatpush1.msra.mxu1 %v1129_v59  ;;  %v1523_v42 = vld [vmem:[#allocation4 + $0x1e8] sm:$0xff]  ;;  %v1522_v44 = vld [vmem:[#allocation4 + $0x1e0] sm:$0xff]  ;;  %v1521_v46 = vld [vmem:[#allocation4 + $0x1d8] sm:$0xff] }
  0x30   :  { %1659 = vmatprep.subr.mxu0 %v1487_v48  ;;  %1332 = vmatprep.subr.mxu1 %v1128_v61  ;;  %v1170_v43 = vld [vmem:[#allocation4 + $0x3c8] sm:$0xff]  ;;  %v1169_v45 = vld [vmem:[#allocation4 + $0x3c0] sm:$0xff]  ;;  %v1168_v47 = vld [vmem:[#allocation4 + $0x3b8] sm:$0xff] }
  0x31   :  { %1660 = vmatpush1.msra.mxu0 %v1486_v50  ;;  %1333 = vmatpush1.msra.mxu1 %v1127_v63  ;;  %v1520_v48 = vld [vmem:[#allocation4 + $0x1d0] sm:$0xff]  ;;  %v1519_v50 = vld [vmem:[#allocation4 + $0x1c8] sm:$0xff]  ;;  %v1165_v53 = vld [vmem:[#allocation4 + $0x3a0] sm:$0xff] }
  0x32   :  { %1661 = vmatprep.subr.mxu0 %v1485_v52  ;;  %1334 = vmatprep.subr.mxu1 %v1126_v1  ;;  %v1167_v49 = vld [vmem:[#allocation4 + $0x3b0] sm:$0xff]  ;;  %v1166_v51 = vld [vmem:[#allocation4 + $0x3a8] sm:$0xff]  ;;  %v1518_v52 = vld [vmem:[#allocation4 + $0x1c0] sm:$0xff] }
  0x33   :  { %1662 = vmatpush1.msra.mxu0 %v1484_v54  ;;  %1335 = vmatpush1.msra.mxu1 %v1125_v3  ;;  %v1517_v54 = vld [vmem:[#allocation4 + $0x1b8] sm:$0xff]  ;;  %v1163_v57 = vld [vmem:[#allocation4 + $0x390] sm:$0xff]  ;;  %v1162_v59 = vld [vmem:[#allocation4 + $0x388] sm:$0xff] }
  0x34   :  { %1663 = vmatprep.subr.mxu0 %v1483_v56  ;;  %1336 = vmatprep.subr.mxu1 %v1124_v5  ;;  %v1164_v55 = vld [vmem:[#allocation4 + $0x398] sm:$0xff]  ;;  %v1516_v56 = vld [vmem:[#allocation4 + $0x1b0] sm:$0xff]  ;;  %v1161_v61 = vld [vmem:[#allocation4 + $0x380] sm:$0xff] }
  0x35   :  { %1664 = vmatpush1.msra.mxu0 %v1482_v58  ;;  %1337 = vmatpush1.msra.mxu1 %v1123_v7  ;;  %v1515_v58 = vld [vmem:[#allocation4 + $0x1a8] sm:$0xff]  ;;  %v1160_v63 = vld [vmem:[#allocation4 + $0x378] sm:$0xff]  ;;  %v1159_v1 = vld [vmem:[#allocation4 + $0x370] sm:$0xff] }
  0x36   :  { %1665 = vmatprep.subr.mxu0 %v1481_v60  ;;  %1338 = vmatprep.subr.mxu1 %v1122_v9  ;;  %v1514_v60 = vld [vmem:[#allocation4 + $0x1a0] sm:$0xff]  ;;  %v1158_v3 = vld [vmem:[#allocation4 + $0x368] sm:$0xff]  ;;  %v1156_v7 = vld [vmem:[#allocation4 + $0x358] sm:$0xff] }
  0x37   :  { %1666 = vmatpush1.msra.mxu0 %v1480_v62  ;;  %1339 = vmatpush1.msra.mxu1 %v1121_v11  ;;  %v1513_v62 = vld [vmem:[#allocation4 + $0x198] sm:$0xff]  ;;  %v1157_v5 = vld [vmem:[#allocation4 + $0x360] sm:$0xff]  ;;  %v1155_v9 = vld [vmem:[#allocation4 + $0x350] sm:$0xff] }
  0x38   :  { %1667 = vmatprep.subr.mxu0 %v1479_v0  ;;  %1340 = vmatprep.subr.mxu1 %v1120_v13  ;;  %v1512_v0 = vld [vmem:[#allocation4 + $0x190] sm:$0xff]  ;;  %v1154_v11 = vld [vmem:[#allocation4 + $0x348] sm:$0xff]  ;;  %v1153_v13 = vld [vmem:[#allocation4 + $0x340] sm:$0xff] }
  0x39   :  { %1668 = vmatpush1.msra.mxu0 %v1478_v2  ;;  %1341 = vmatpush1.msra.mxu1 %v1119_v15  ;;  %v1511_v2 = vld [vmem:[#allocation4 + $0x188] sm:$0xff]  ;;  %v1152_v15 = vld [vmem:[#allocation4 + $0x338] sm:$0xff] }
  0x3a   :  { %1669 = vmatprep.subr.mxu0 %v1477_v4  ;;  %1342 = vmatprep.subr.mxu1 %v1118_v17  ;;  %v1510_v4 = vld [vmem:[#allocation4 + $0x180] sm:$0xff]  ;;  %v1151_v17 = vld [vmem:[#allocation4 + $0x330] sm:$0xff] }
  0x3b   :  { %1670 = vmatpush1.msra.mxu0 %v1476_v6  ;;  %1343 = vmatpush1.msra.mxu1 %v1117_v19  ;;  %v1509_v6 = vld [vmem:[#allocation4 + $0x178] sm:$0xff]  ;;  %v1150_v19 = vld [vmem:[#allocation4 + $0x328] sm:$0xff] }
  0x3c   :  { %1671 = vmatprep.subr.mxu0 %v1475_v8  ;;  %1344 = vmatprep.subr.mxu1 %v1116_v21  ;;  %v1508_v8 = vld [vmem:[#allocation4 + $0x170] sm:$0xff]  ;;  %v1149_v21 = vld [vmem:[#allocation4 + $0x320] sm:$0xff] }
  0x3d   :  { %1672 = vmatpush1.msra.mxu0 %v1474_v10  ;;  %1345 = vmatpush1.msra.mxu1 %v1115_v23  ;;  %v1507_v10 = vld [vmem:[#allocation4 + $0x168] sm:$0xff]  ;;  %v1148_v23 = vld [vmem:[#allocation4 + $0x318] sm:$0xff] }
  0x3e   :  { %1673 = vmatprep.subr.mxu0 %v1473_v12  ;;  %1346 = vmatprep.subr.mxu1 %v1114_v25  ;;  %v1506_v12 = vld [vmem:[#allocation4 + $0x160] sm:$0xff]  ;;  %v1147_v25 = vld [vmem:[#allocation4 + $0x310] sm:$0xff] }
  0x3f   :  { %1674 = vmatpush1.msra.mxu0 %v1472_v14  ;;  %1347 = vmatpush1.msra.mxu1 %v1113_v27  ;;  %v1505_v14 = vld [vmem:[#allocation4 + $0x158] sm:$0xff]  ;;  %v1146_v27 = vld [vmem:[#allocation4 + $0x308] sm:$0xff] }
  0x40   :  { %1675 = vmatprep.subr.mxu0 %v1471_v16  ;;  %1348 = vmatprep.subr.mxu1 %v1176_v29  ;;  %v1504_v16 = vld [vmem:[#allocation4 + $0x150] sm:$0xff]  ;;  %v1145_v29 = vld [vmem:[#allocation4 + $0x300] sm:$0xff] }
  0x41   :  { %1676 = vmatpush1.msra.mxu0 %v1470_v18  ;;  %1349 = vmatpush2.msra.mxu1 %v1175_v31  ;;  %v1503_v18 = vld [vmem:[#allocation4 + $0x148] sm:$0xff]  ;;  %v1496_v31 = vld [vmem:[#allocation4 + $0x110] sm:$0xff] }
  0x42   :  { %1677 = vmatprep.subr.mxu0 %v1469_v20  ;;  %1350 = vmatprep.subr.mxu1 %v1174_v33  ;;  %v1502_v20 = vld [vmem:[#allocation4 + $0x140] sm:$0xff]  ;;  %v1495_v33 = vld [vmem:[#allocation4 + $0x108] sm:$0xff] }
  0x43   :  { %1678 = vmatpush1.msra.mxu0 %v1468_v22  ;;  %1351 = vmatpush2.msra.mxu1 %v1173_v36  ;;  %v1501_v22 = vld [vmem:[#allocation4 + $0x138] sm:$0xff]  ;;  %v3186_v36 = vshrl.u32 %v73_v35, 7 }
  0x44   :  { %1679 = vmatprep.subr.mxu0 %v1467_v24  ;;  %1352 = vmatprep.subr.mxu1 %v1172_v38  ;;  %v1500_v24 = vld [vmem:[#allocation4 + $0x130] sm:$0xff]  ;;  %v69_v38 = vld [vmem:[%s3772_s2] sm:$0xff] }
  0x45   :  { %1680 = vmatpush1.msra.mxu0 %v1466_v26  ;;  %1353 = vmatpush2.msra.mxu1 %v1171_v41  ;;  %v1499_v26 = vld [vmem:[#allocation4 + $0x128] sm:$0xff]  ;;  %v3014_v41 = vmov 1966171168   ;;  %v87_v35 = vsub.s32 3, %v3186_v36 }
  0x46   :  { %1681 = vmatprep.subr.mxu0 %v1465_v28  ;;  %1354 = vmatprep.subr.mxu1 %v1170_v43  ;;  %v1498_v28 = vld [vmem:[#allocation4 + $0x120] sm:$0xff] }
  0x47   :  { %1682 = vmatpush1.msra.mxu0 %v1464_v30  ;;  %1355 = vmatpush2.msra.mxu1 %v1169_v45  ;;  %v1497_v30 = vld [vmem:[#allocation4 + $0x118] sm:$0xff] }
  0x48   :  { %1683 = vmatprep.subr.mxu0 %v1463_v32  ;;  %1356 = vmatprep.subr.mxu1 %v1168_v47  ;;  %v1429_v32 = vld [vmem:[#allocation4 + $0x4f8] sm:$0xff] }
  0x49   :  { %1684 = vmatpush1.msra.mxu0 %v1462_v34  ;;  %1357 = vmatpush2.msra.mxu1 %v1167_v49  ;;  %v1494_v34 = vld [vmem:[#allocation4 + $0x100] sm:$0xff] }
  0x4a   :  { %1685 = vmatprep.subr.mxu0 %v1525_v37  ;;  %1358 = vmatprep.subr.mxu1 %v1166_v51  ;;  %v3189_v37 = vsub.s32 0, %v3186_v36  ;;  %v91_v51 = vsub.s32 4, %v3186_v36 }
  0x4b   :  { %1686 = vmatpush2.msra.mxu0 %v1524_v39  ;;  %1359 = vmatpush2.msra.mxu1 %v1165_v53  ;;  %v3195_v39 = vsub.s32 1, %v3186_v36  ;;  %v88_v53 = vrot.slane %v69_v38, %v87_v35 }
  0x4c   :  { %1687 = vmatprep.subr.mxu0 %v1523_v42  ;;  %1360 = vmatprep.subr.mxu1 %v1164_v55  ;;  %v662_v42 = vunpack.c.l.s4 %v3014_v41  ;;  %v76_v43 = vrot.slane %v69_v38, %v3189_v37 }
  0x4d   :  { %1688 = vmatpush2.msra.mxu0 %v1522_v44  ;;  %1361 = vmatpush2.msra.mxu1 %v1163_v57  ;;  %v83_v44 = vsub.s32 2, %v3186_v36  ;;  %v80_v45 = vrot.slane %v69_v38, %v3195_v39 }
  0x4e   :  { %1689 = vmatprep.subr.mxu0 %v1521_v46  ;;  %1362 = vmatprep.subr.mxu1 %v1162_v59  ;;  %v663_v47 = vunpack.c.0.s8 %v662_v42 }
  0x4f   :  { %1690 = vmatpush2.msra.mxu0 %v1520_v48  ;;  %1363 = vmatpush2.msra.mxu1 %v1161_v61  ;;  %v84_v49 = vrot.slane %v69_v38, %v83_v44 }
  0x50   :  { %1691 = vmatprep.subr.mxu0 %v1519_v50  ;;  %1364 = vmatprep.subr.mxu1 %v1160_v63 }
  0x51   :  { %1692 = vmatpush2.msra.mxu0 %v1518_v52  ;;  %1365 = vmatpush2.msra.mxu1 %v1159_v1  ;;  %v103_v1 = vsub.s32 7, %v3186_v36 }
  0x52   :  { %1693 = vmatprep.subr.mxu0 %v1517_v54  ;;  %1366 = vmatprep.subr.mxu1 %v1158_v3  ;;  %v3205_v54 = vsub.s32 %v663_v47, %v3186_v36 }
  0x53   :  { %1694 = vmatpush2.msra.mxu0 %v1516_v56  ;;  %1367 = vmatpush2.msra.mxu1 %v1157_v5  ;;  %v95_v56 = vsub.s32 5, %v3186_v36 }
  0x54   :  { %1695 = vmatprep.subr.mxu0 %v1515_v58  ;;  %1368 = vmatprep.subr.mxu1 %v1156_v7 }
  0x55   :  { %1696 = vmatpush2.msra.mxu0 %v1514_v60  ;;  %1369 = vmatpush2.msra.mxu1 %v1155_v9  ;;  %v99_v60 = vsub.s32 6, %v3186_v36  ;;  %v96_v3 = vrot.slane %v69_v38, %v95_v56 }
  0x56   :  { %1697 = vmatprep.subr.mxu0 %v1513_v62  ;;  %1370 = vmatprep.subr.mxu1 %v1154_v11  ;;  %v92_v62 = vrot.slane %v69_v38, %v91_v51 }
  0x57   :  { %1698 = vmatpush2.msra.mxu0 %v1512_v0  ;;  %1371 = vmatpush2.msra.mxu1 %v1153_v13  ;;  %v100_v7 = vrot.slane %v69_v38, %v99_v60 }
  0x58   :  { %1699 = vmatprep.subr.mxu0 %v1511_v2  ;;  %1372 = vmatprep.subr.mxu1 %v1152_v15 }
  0x59   :  { %1700 = vmatpush2.msra.mxu0 %v1510_v4  ;;  %1373 = vmatpush2.msra.mxu1 %v1151_v17 }
  0x5a   :  { %1701 = vmatprep.subr.mxu0 %v1509_v6  ;;  %1374 = vmatprep.subr.mxu1 %v1150_v19 }
  0x5b   :  { %1702 = vmatpush2.msra.mxu0 %v1508_v8  ;;  %1375 = vmatpush2.msra.mxu1 %v1149_v21 }
  0x5c   :  { %1703 = vmatprep.subr.mxu0 %v1507_v10  ;;  %1376 = vmatprep.subr.mxu1 %v1148_v23  ;;  %v70_v10 = vld [vmem:[%s3772_s2 + $0x8] sm:$0x3f] }
  0x5d   :  { %1704 = vmatpush2.msra.mxu0 %v1506_v12  ;;  %1377 = vmatpush2.msra.mxu1 %v1147_v25  ;;  %v116_v41 = vrot.slane %v70_v10, %v83_v44 }
  0x5e   :  { %1705 = vmatprep.subr.mxu0 %v1505_v14  ;;  %1378 = vmatprep.subr.mxu1 %v1146_v27  ;;  %v104_v14 = vrot.slane %v69_v38, %v103_v1  ;;  %v112_v27 = vrot.slane %v70_v10, %v3195_v39 }
  0x5f   :  { %1706 = vmatpush2.msra.mxu0 %v1504_v16  ;;  %1379 = vmatpush2.msra.mxu1 %v1145_v29 }
  0x60   :  { %1707 = vmatprep.subr.mxu0 %v1503_v18  ;;  %1730 = vmatprep.subr.mxu1 %v1429_v32 }
  0x61   :  { %1708 = vmatpush2.msra.mxu0 %v1502_v20  ;;  %v108_v20 = vrot.slane %v70_v10, %v3189_v37 }
  0x62   :  { %1709 = vmatprep.subr.mxu0 %v1501_v22 }
  0x63   :  { %1710 = vmatpush2.msra.mxu0 %v1500_v24 }
  0x64   :  { %1711 = vmatprep.subr.mxu0 %v1499_v26 }
  0x65   :  { %1712 = vmatpush2.msra.mxu0 %v1498_v28 }
  0x66   :  { %1713 = vmatprep.subr.mxu0 %v1497_v30 }
  0x67   :  { %1714 = vmatpush2.msra.mxu0 %v1496_v31 }
  0x68   :  { %1715 = vmatprep.subr.mxu0 %v1495_v33 }
  0x69   :  { %1716 = vmatpush2.msra.mxu0 %v1494_v34 }
  0xd2   :  { %v213_v46 = vpop.f32.mrf.mxu0 }
  0xd3   :  { %v214_v48 = vadd.f32 %v213_v46, %v76_v43 }
  0xd4   :  { %v215_v50 = vpop.f32.mrf.mxu0 }
  0xd5   :  { %v216_v52 = vadd.f32 %v215_v50, %v80_v45  ;;  %v644_v57 = vmax.f32 %v214_v48, 0.0  ;;  %v120_v48 = vrot.slane %v70_v10, %v87_v35  ;;  %v128_v35 = vrot.slane %v70_v10, %v95_v56 }
  0xd6   :  { %v284_v55 = vpop.f32.mrf.mxu0 }
  0xd7   :  { %v645_v58 = vmax.f32 %v216_v52, 0.0  ;;  %v285_v59 = vadd.f32 %v284_v55, %v84_v49 }
  0xd8   :  { %v286_v61 = vpop.f32.mrf.mxu0 }
  0xd9   :  { %v660_v63 = vcombine.low %v644_v57, %v645_v58  ;;  %v287_v0 = vadd.f32 %v286_v61, %v88_v53  ;;  %v646_v5 = vmax.f32 %v285_v59, 0.0  ;;  %v124_v53 = vrot.slane %v70_v10, %v91_v51 }
  0xda   :  { %v355_v2 = vpop.f32.mrf.mxu0 }
  0xdb   :  { %v667_v4 = vrot.slane %v660_v63, %v3205_v54  ;;  %v647_v6 = vmax.f32 %v287_v0, 0.0  ;;  %v356_v8 = vadd.f32 %v355_v2, %v92_v62 }
  0xdc   :  { %v357_v9 = vpop.f32.mrf.mxu0 }
  0xdd   :  { %v668_v11 = vcombine.high %v667_v4, %v667_v4  ;;  %v675_v12 = vrot.slane %v667_v4, %v3205_v54  ;;  %v696_v13 = vcombine.low %v646_v5, %v647_v6  ;;  %v358_v15 = vadd.f32 %v357_v9, %v96_v3 }
  0xde   :  { %v426_v16 = vpop.f32.mrf.mxu0  ;;  %v648_v21 = vmax.f32 %v356_v8, 0.0 }
  0xdf   :  { %v682_v17 = vrot.slane %v668_v11, %v3205_v54  ;;  %689 = vst.msk [vmem:[#allocation2] ss:$8 sm:$0x3] %vm3169_vm1, %v675_v12  ;;  %v703_v18 = vrot.slane %v696_v13, %v3205_v54  ;;  %v427_v19 = vadd.f32 %v426_v16, %v100_v7  ;;  %v649_v22 = vmax.f32 %v358_v15, 0.0 }
  0xe0   :  { %v428_v23 = vpop.f32.mrf.mxu0 }
  0xe1   :  { %692 = vst.msk [vmem:[#allocation2 + $0x10] ss:$8 sm:$0x3] %vm3169_vm1, %v682_v17  ;;  %v704_v24 = vcombine.high %v703_v18, %v703_v18  ;;  %v711_v25 = vrot.slane %v703_v18, %v3205_v54  ;;  %v429_v26 = vadd.f32 %v428_v23, %v104_v14  ;;  %v729_v28 = vcombine.low %v648_v21, %v649_v22 }
  0xe2   :  { %v497_v29 = vpop.f32.mrf.mxu0  ;;  %v650_v31 = vmax.f32 %v427_v19, 0.0 }
  0xe3   :  { %v718_v30 = vrot.slane %v704_v24, %v3205_v54  ;;  %722 = vst.msk [vmem:[#allocation2 + $0x1] ss:$8 sm:$0x3] %vm3169_vm1, %v711_v25  ;;  %v651_v32 = vmax.f32 %v429_v26, 0.0  ;;  %v498_v33 = vadd.f32 %v497_v29, %v108_v20  ;;  %v736_v34 = vrot.slane %v729_v28, %v3205_v54 }
  0xe4   :  { %v499_v38 = vpop.f32.mrf.mxu0 }
  0xe5   :  { %725 = vst.msk [vmem:[#allocation2 + $0x11] ss:$8 sm:$0x3] %vm3169_vm1, %v718_v30  ;;  %v762_v42 = vcombine.low %v650_v31, %v651_v32  ;;  %v500_v43 = vadd.f32 %v499_v38, %v112_v27  ;;  %v737_v45 = vcombine.high %v736_v34, %v736_v34  ;;  %v744_v46 = vrot.slane %v736_v34, %v3205_v54 }
  0xe6   :  { %v568_v47 = vpop.f32.mrf.mxu0  ;;  %v652_v50 = vmax.f32 %v498_v33, 0.0 }
  0xe7   :  { %v769_v49 = vrot.slane %v762_v42, %v3205_v54  ;;  %v653_v52 = vmax.f32 %v500_v43, 0.0  ;;  %v751_v44 = vrot.slane %v737_v45, %v3205_v54  ;;  %755 = vst.msk [vmem:[#allocation2 + $0x2] ss:$8 sm:$0x3] %vm3169_vm1, %v744_v46  ;;  %v569_v55 = vadd.f32 %v568_v47, %v116_v41 }
  0xe8   :  { %v570_v57 = vpop.f32.mrf.mxu0 }
  0xe9   :  { %v770_v58 = vcombine.high %v769_v49, %v769_v49  ;;  %v777_v59 = vrot.slane %v769_v49, %v3205_v54  ;;  %v795_v60 = vcombine.low %v652_v50, %v653_v52  ;;  %758 = vst.msk [vmem:[#allocation2 + $0x12] ss:$8 sm:$0x3] %vm3169_vm1, %v751_v44  ;;  %v571_v61 = vadd.f32 %v570_v57, %v120_v48 }
  0xea   :  { %v639_v62 = vpop.f32.mrf.mxu0  ;;  %v654_v1 = vmax.f32 %v569_v55, 0.0 }
  0xeb   :  { %v784_v51 = vrot.slane %v770_v58, %v3205_v54  ;;  %788 = vst.msk [vmem:[#allocation2 + $0x3] ss:$8 sm:$0x3] %vm3169_vm1, %v777_v59  ;;  %v802_v63 = vrot.slane %v795_v60, %v3205_v54  ;;  %v640_v0 = vadd.f32 %v639_v62, %v124_v53  ;;  %v655_v2 = vmax.f32 %v571_v61, 0.0 }
  0xec   :  { %v641_v3 = vpop.f32.mrf.mxu0 }
  0xed   :  { %791 = vst.msk [vmem:[#allocation2 + $0x13] ss:$8 sm:$0x3] %vm3169_vm1, %v784_v51  ;;  %v803_v36 = vcombine.high %v802_v63, %v802_v63  ;;  %v810_v56 = vrot.slane %v802_v63, %v3205_v54  ;;  %v642_v4 = vadd.f32 %v641_v3, %v128_v35  ;;  %v828_v5 = vcombine.low %v654_v1, %v655_v2 }
  0xee   :  { %v656_v7 = vmax.f32 %v640_v0, 0.0 }
  0xef   :  { %v817_v6 = vrot.slane %v803_v36, %v3205_v54  ;;  %821 = vst.msk [vmem:[#allocation2 + $0x4] ss:$8 sm:$0x3] %vm3169_vm1, %v810_v56  ;;  %v657_v8 = vmax.f32 %v642_v4, 0.0  ;;  %v835_v9 = vrot.slane %v828_v5, %v3205_v54 }
  0xf1   :  { %824 = vst.msk [vmem:[#allocation2 + $0x14] ss:$8 sm:$0x3] %vm3169_vm1, %v817_v6  ;;  %v861_v10 = vcombine.low %v656_v7, %v657_v8  ;;  %v836_v11 = vcombine.high %v835_v9, %v835_v9  ;;  %v843_v12 = vrot.slane %v835_v9, %v3205_v54 }
  0xf2   :  { %v2962_v18 = vld [vmem:[#allocation2] ss:$8 sps:$4 sm:$0xff]  }
  0xf3   :  { %v868_v13 = vrot.slane %v861_v10, %v3205_v54  ;;  %v850_v14 = vrot.slane %v836_v11, %v3205_v54  ;;  %854 = vst.msk [vmem:[#allocation2 + $0x5] ss:$8 sm:$0x3] %vm3169_vm1, %v843_v12  ;;  %v914_v20 = vrot.slane %v2962_v18, %v3205_v54  ;;  %v2968_v30 = vld [vmem:[#allocation2] ss:$8 sps:$4 sm:$0xee]  }
  0xf4   :  { %v2965_v21 = vld [vmem:[#allocation2 + $0x10] ss:$8 sps:$4 sm:$0xff]   ;;  %v1020_v45 = vrot.slane %v2968_v30, %v3205_v54 }
  0xf5   :  { %v869_v15 = vcombine.high %v868_v13, %v868_v13  ;;  %v876_v16 = vrot.slane %v868_v13, %v3205_v54  ;;  %857 = vst.msk [vmem:[#allocation2 + $0x15] ss:$8 sm:$0x3] %vm3169_vm1, %v850_v14  ;;  %v922_v24 = vcombine.high %v914_v20, %v914_v20  ;;  %v963_v25 = vrot.slane %v2965_v21, %v3205_v54  ;;  %v2971_v31 = vld [vmem:[#allocation2 + $0x10] ss:$8 sps:$4 sm:$0xee]  }
  0xf6   :  { %v930_v28 = vrot.slane %v914_v20, %v3205_v54  ;;  %v3286_v46 = vrot.slane %v2971_v31, %v3205_v54  ;;  %v1028_v44 = vcombine.high %v1020_v45, %v1020_v45  ;;  %v1036_v55 = vrot.slane %v1020_v45, %v3205_v54 }
  0xf7   :  { %v883_v17 = vrot.slane %v869_v15, %v3205_v54  ;;  %887 = vst.msk [vmem:[#allocation2 + $0x6] ss:$8 sm:$0x3] %vm3169_vm1, %v876_v16  ;;  %v944_v33 = vrot.slane %v922_v24, %v3205_v54  ;;  %v971_v34 = vcombine.high %v963_v25, %v963_v25  ;;  %v979_v38 = vrot.slane %v963_v25, %v3205_v54 }
  0xf8   :  { %v1050_v62 = vrot.slane %v1028_v44, %v3205_v54  ;;  %v1058_v51 = vcombine.high %v1036_v55, %v1036_v55  ;;  %v1078_v4 = vcombine.high %v3286_v46, %v3286_v46  ;;  %v1086_v31 = vrot.slane %v3286_v46, %v3205_v54 }
  0xf9   :  { %890 = vst.msk [vmem:[#allocation2 + $0x16] ss:$8 sm:$0x3] %vm3169_vm1, %v883_v17  ;;  %v1001_v47 = vcombine.high %v979_v38, %v979_v38  ;;  %v1189_v48 = vcombine.low %v930_v28, %v944_v33  ;;  %v2770_v49 = vcombine.high %v930_v28, %v944_v33 }
  0xfa   :  { %v1060_v56 = vcombine.high %v1050_v62, %v1050_v62  ;;  %v1526_v7 = vcombine.low %v1050_v62, %v1058_v51  ;;  %v1100_v12 = vrot.slane %v1078_v4, %v3205_v54 }
  0xfb   :  { %v1199_v57 = vrot.slane %v1189_v48, %v3205_v54  ;;  %v1206_v58 = vrot.slane %v2770_v49, %v3205_v54  ;;  %v1425_v49 = vld [vmem:[#allocation4 + $0x4d8] sm:$0xff] }
  0xfc   :  { %v1536_v14 = vrot.slane %v1526_v7, %v3205_v54  ;;  %v1419_v7 = vld [vmem:[#allocation4 + $0x4a8] sm:$0xff] }
  0xfd   :  { %v1222_v63 = vcombine.high %v1199_v57, %v1206_v58  ;;  %v1221_v0 = vcombine.low %v1199_v57, %v1206_v58  ;;  %v2771_v57 = vcombine.high %v1086_v31, %v1100_v12  ;;  %v1423_v58 = vld [vmem:[#allocation4 + $0x4c8] sm:$0xff] }
  0xfe   :  { %v2964_v19 = vld [vmem:[#allocation2 + $0x4] ss:$8 sps:$4 sm:$0x77]  }
  0xff   :  { %v921_v22 = vrot.slane %v2964_v19, %v3205_v54  ;;  %v2970_v26 = vld [vmem:[#allocation2 + $0x4] ss:$8 sps:$4 sm:$0xff]   ;;  %v1238_v5 = vrot.slane %v1222_v63, %v3205_v54  ;;  %v1231_v6 = vrot.slane %v1221_v0, %v3205_v54 }
 0x100   :  { %v2967_v23 = vld [vmem:[#allocation2 + $0x14] ss:$8 sps:$4 sm:$0x77]   ;;  %v1027_v41 = vrot.slane %v2970_v26, %v3205_v54  ;;  %v1411_v31 = vld [vmem:[#allocation4 + $0x468] sm:$0xff] }
 0x101   :  { %v923_v27 = vcombine.high %v921_v22, %v921_v22  ;;  %v937_v29 = vrot.slane %v921_v22, %v3205_v54  ;;  %v970_v32 = vrot.slane %v2967_v23, %v3205_v54  ;;  %v2973_v9 = vld [vmem:[#allocation2 + $0x14] ss:$8 sps:$4 sm:$0xff]   ;;  %v993_v23 = vrot.slane %v971_v34, %v3205_v54 }
 0x102   :  { %v1029_v50 = vcombine.high %v1027_v41, %v1027_v41  ;;  %v1043_v59 = vrot.slane %v1027_v41, %v3205_v54  ;;  %v1428_v22 = vld [vmem:[#allocation4 + $0x4f0] sm:$0xff]  ;;  %v1077_v26 = vrot.slane %v2973_v9, %v3205_v54 }
 0x103   :  { %v951_v42 = vrot.slane %v923_v27, %v3205_v54  ;;  %v953_v43 = vcombine.high %v937_v29, %v937_v29  ;;  %v972_v16 = vcombine.high %v970_v32, %v970_v32  ;;  %v986_v17 = vrot.slane %v970_v32, %v3205_v54  ;;  %v1426_v32 = vld [vmem:[#allocation4 + $0x4e0] sm:$0xff] }
 0x104   :  { %v1057_v60 = vrot.slane %v1029_v50, %v3205_v54  ;;  %v1059_v1 = vcombine.high %v1043_v59, %v1043_v59  ;;  %v1527_v13 = vcombine.low %v1060_v56, %v1043_v59  ;;  %v1003_v33 = vcombine.high %v993_v23, %v993_v23  ;;  %v1420_v56 = vld [vmem:[#allocation4 + $0x4b0] sm:$0xff] }
 0x105   :  { %v1191_v52 = vcombine.low %v937_v29, %v951_v42  ;;  %v1192_v53 = vcombine.low %v953_v43, %v979_v38  ;;  %v1000_v24 = vrot.slane %v972_v16, %v3205_v54  ;;  %v1002_v25 = vcombine.high %v986_v17, %v986_v17  ;;  %v1427_v29 = vld [vmem:[#allocation4 + $0x4e8] sm:$0xff] }
 0x106   :  { %v1061_v2 = vcombine.high %v1057_v60, %v1057_v60  ;;  %v1528_v8 = vcombine.low %v1057_v60, %v1059_v1  ;;  %v1543_v21 = vrot.slane %v1527_v13, %v3205_v54  ;;  %v1255_v34 = vcombine.low %v993_v23, %v1001_v47  ;;  %v1421_v1 = vld [vmem:[#allocation4 + $0x4b8] sm:$0xff]  ;;  %v1416_v23 = vld [vmem:[#allocation4 + $0x490] sm:$0xff] }
 0x107   :  { %v1213_v35 = vrot.slane %v1191_v52, %v3205_v54  ;;  %v1220_v61 = vrot.slane %v1192_v53, %v3205_v54  ;;  %v1257_v38 = vcombine.low %v1000_v24, %v1002_v25  ;;  %v1079_v41 = vcombine.high %v1077_v26, %v1077_v26  ;;  %v1424_v53 = vld [vmem:[#allocation4 + $0x4d0] sm:$0xff]  ;;  %v1415_v25 = vld [vmem:[#allocation4 + $0x488] sm:$0xff] }
 0x108   :  { %v1550_v15 = vrot.slane %v1528_v8, %v3205_v54  ;;  %v1529_v20 = vcombine.low %v1061_v2, %v1100_v12  ;;  %v1559_v28 = vcombine.high %v1536_v14, %v1543_v21  ;;  %v1558_v30 = vcombine.low %v1536_v14, %v1543_v21 }
 0x109   :  { %v1224_v3 = vcombine.high %v1213_v35, %v1220_v61  ;;  %v1223_v36 = vcombine.low %v1213_v35, %v1220_v61  ;;  %v1256_v50 = vcombine.low %v1003_v33, %v986_v17  ;;  %v1278_v52 = vrot.slane %v1257_v38, %v3205_v54  ;;  %v1422_v61 = vld [vmem:[#allocation4 + $0x4c0] sm:$0xff]  ;;  %v1409_v33 = vld [vmem:[#allocation4 + $0x458] sm:$0xff]  ;;  %v1407_v38 = vld [vmem:[#allocation4 + $0x448] sm:$0xff] }
 0x10a   :  { %v1557_v27 = vrot.slane %v1529_v20, %v3205_v54  ;;  %v1575_v43 = vrot.slane %v1559_v28, %v3205_v54  ;;  %v1568_v48 = vrot.slane %v1558_v30, %v3205_v54  ;;  %v1093_v46 = vrot.slane %v1077_v26, %v3205_v54  ;;  %v1412_v30 = vld [vmem:[#allocation4 + $0x470] sm:$0xff] }
 0x10b   :  { %v1252_v10 = vrot.slane %v1224_v3, %v3205_v54  ;;  %v1245_v11 = vrot.slane %v1223_v36, %v3205_v54  ;;  %v1107_v55 = vrot.slane %v1079_v41, %v3205_v54  ;;  %v1264_v59 = vrot.slane %v1255_v34, %v3205_v54  ;;  %v1408_v34 = vld [vmem:[#allocation4 + $0x450] sm:$0xff]  ;;  %v1406_v41 = vld [vmem:[#allocation4 + $0x440] sm:$0xff] }
 0x10c   :  { %v1561_v42 = vcombine.high %v1550_v15, %v1557_v27  ;;  %v1560_v45 = vcombine.low %v1550_v15, %v1557_v27  ;;  %v1271_v60 = vrot.slane %v1256_v50, %v3205_v54  ;;  %v1281_v35 = vcombine.high %v1278_v52, %v1278_v52  ;;  %v1417_v15 = vld [vmem:[#allocation4 + $0x498] sm:$0xff]  ;;  %v1414_v27 = vld [vmem:[#allocation4 + $0x480] sm:$0xff]  ;;  %v1399_v50 = vld [vmem:[#allocation4 + $0x408] sm:$0xff] }
 0x10d   :  { %v3306_v18 = vcombine.low %v1238_v5, %v1252_v10  ;;  %v3308_v19 = vcombine.low %v1231_v6, %v1245_v11  ;;  %v1593_v63 = vcombine.low %v1093_v46, %v1107_v55  ;;  %v2772_v0 = vcombine.high %v1093_v46, %v1107_v55  ;;  %v1418_v11 = vld [vmem:[#allocation4 + $0x4a0] sm:$0xff]  ;;  %v1461_v46 = vld [vmem:[#allocation4 + $0x5f8] sm:$0xff] }
 0x10e   :  { %v1589_v44 = vrot.slane %v1561_v42, %v3205_v54  ;;  %v1582_v47 = vrot.slane %v1560_v45, %v3205_v54  ;;  %v1280_v2 = vcombine.high %v1264_v59, %v1271_v60  ;;  %v1601_v3 = vrot.slane %v2771_v57, %v3205_v54  ;;  %v1404_v42 = vld [vmem:[#allocation4 + $0x430] sm:$0xff]  ;;  %v1402_v45 = vld [vmem:[#allocation4 + $0x420] sm:$0xff]  ;;  %v1457_v55 = vld [vmem:[#allocation4 + $0x5d8] sm:$0xff] }
 0x10f   :  { %1380 = vmatprep.mubr.f32.mxu1 %v3306_v18  ;;  %v1279_v36 = vcombine.low %v1264_v59, %v1271_v60  ;;  %v1608_v4 = vrot.slane %v1593_v63, %v3205_v54  ;;  %v1615_v5 = vrot.slane %v2772_v0, %v3205_v54  ;;  %v1302_v6 = vrot.slane %v1278_v52, %v3205_v54  ;;  %v1398_v52 = vld [vmem:[#allocation4 + $0x400] sm:$0xff]  ;;  %v1456_v57 = vld [vmem:[#allocation4 + $0x5d0] sm:$0xff]  ;;  %v1453_v60 = vld [vmem:[#allocation4 + $0x5b8] sm:$0xff] }
 0x110   :  { %1381 = vmatmul.mubr.f32.vlgmr.msra.gmra.mxu1 %v3308_v19  ;;  %v1591_v62 = vcombine.low %v1575_v43, %v1589_v44  ;;  %v1590_v51 = vcombine.low %v1568_v48, %v1582_v47  ;;  %v1295_v8 = vrot.slane %v1280_v2, %v3205_v54  ;;  %v1309_v9 = vrot.slane %v1281_v35, %v3205_v54  ;;  %v1403_v43 = vld [vmem:[#allocation4 + $0x428] sm:$0xff]  ;;  %v1401_v48 = vld [vmem:[#allocation4 + $0x418] sm:$0xff]  ;;  %v1458_v47 = vld [vmem:[#allocation4 + $0x5e0] sm:$0xff] }
 0x111   :  { %1731 = vmatpush1.msra.mxu1 %v1428_v22  ;;  %v1288_v10 = vrot.slane %v1279_v36, %v3205_v54  ;;  %v1617_v12 = vcombine.high %v1601_v3, %v1608_v4  ;;  %v1618_v13 = vcombine.high %v1615_v5, %v1615_v5  ;;  %v1616_v14 = vcombine.low %v1601_v3, %v1608_v4  ;;  %v1459_v44 = vld [vmem:[#allocation4 + $0x5e8] sm:$0xff]  ;;  %v1454_v59 = vld [vmem:[#allocation4 + $0x5c0] sm:$0xff]  ;;  %v1452_v35 = vld [vmem:[#allocation4 + $0x5b0] sm:$0xff] }
 0x112   :  { %1732 = vmatprep.subr.mxu1 %v1427_v29  ;;  %1717 = vmatprep.mubr.f32.mxu0 %v1591_v62  ;;  %v3335_v16 = vcombine.low %v1295_v8, %v1309_v9  ;;  %v1639_v24 = vrot.slane %v1615_v5, %v3205_v54  ;;  %v1413_v29 = vld [vmem:[#allocation4 + $0x478] sm:$0xff]  ;;  %v1450_v62 = vld [vmem:[#allocation4 + $0x5a0] sm:$0xff]  ;;  %v1448_v63 = vld [vmem:[#allocation4 + $0x590] sm:$0xff] }
 0x113   :  { %1733 = vmatpush1.msra.mxu1 %v1426_v32  ;;  %1718 = vmatmul.mubr.f32.vlgmr.msra.gmra.mxu0 %v1590_v51  ;;  %v3337_v17 = vcombine.low %v1288_v10, %v1302_v6  ;;  %v1632_v20 = vrot.slane %v1617_v12, %v3205_v54  ;;  %v1646_v21 = vrot.slane %v1618_v13, %v3205_v54  ;;  %v1410_v32 = vld [vmem:[#allocation4 + $0x460] sm:$0xff]  ;;  %v1449_v51 = vld [vmem:[#allocation4 + $0x598] sm:$0xff]  ;;  %v1447_v0 = vld [vmem:[#allocation4 + $0x588] sm:$0xff] }
 0x114   :  { %1734 = vmatprep.subr.mxu1 %v1425_v49  ;;  %v1625_v22 = vrot.slane %v1616_v14, %v3205_v54  ;;  %1386 = vmatprep.mubr.f32.mxu1 %v3335_v16  ;;  %v1400_v49 = vld [vmem:[#allocation4 + $0x410] sm:$0xff]  ;;  %v1445_v2 = vld [vmem:[#allocation4 + $0x578] sm:$0xff]  ;;  %v1443_v36 = vld [vmem:[#allocation4 + $0x568] sm:$0xff] }
 0x115   :  { %1735 = vmatpush1.msra.mxu1 %v1424_v53  ;;  %v1648_v26 = vcombine.low %v1632_v20, %v1646_v21  ;;  %v1460_v53 = vld [vmem:[#allocation4 + $0x5f0] sm:$0xff]  ;;  %v1441_v4 = vld [vmem:[#allocation4 + $0x558] sm:$0xff]  ;;  %v1439_v6 = vld [vmem:[#allocation4 + $0x548] sm:$0xff] }
 0x116   :  { %1736 = vmatprep.subr.mxu1 %v1423_v58  ;;  %1387 = vmatmul.mubr.f32.gmra.mxu1 %v3337_v17  ;;  %v1647_v28 = vcombine.low %v1625_v22, %v1639_v24  ;;  %v1455_v58 = vld [vmem:[#allocation4 + $0x5c8] sm:$0xff]  ;;  %v1444_v3 = vld [vmem:[#allocation4 + $0x570] sm:$0xff]  ;;  %v1437_v8 = vld [vmem:[#allocation4 + $0x538] sm:$0xff] }
 0x117   :  { %1737 = vmatpush1.msra.mxu1 %v1422_v61  ;;  %1794 = vmatprep.mubr.f32.mxu1 %v3306_v18  ;;  %v1405_v18 = vld [vmem:[#allocation4 + $0x438] sm:$0xff]  ;;  %v1451_v61 = vld [vmem:[#allocation4 + $0x5a8] sm:$0xff]  ;;  %v1440_v5 = vld [vmem:[#allocation4 + $0x550] sm:$0xff] }
 0x118   :  { %1738 = vmatprep.subr.mxu1 %v1421_v1  ;;  %1723 = vmatprep.mubr.f32.mxu0 %v1648_v26  ;;  %v1446_v1 = vld [vmem:[#allocation4 + $0x580] sm:$0xff]  ;;  %v1436_v9 = vld [vmem:[#allocation4 + $0x530] sm:$0xff]  ;;  %v1435_v10 = vld [vmem:[#allocation4 + $0x528] sm:$0xff] }
 0x119   :  { %1739 = vmatpush1.msra.mxu1 %v1420_v56  ;;  %1724 = vmatmul.mubr.f32.gmra.mxu0 %v1647_v28  ;;  %v1442_v56 = vld [vmem:[#allocation4 + $0x560] sm:$0xff]  ;;  %v1433_v12 = vld [vmem:[#allocation4 + $0x518] sm:$0xff]  ;;  %v1432_v13 = vld [vmem:[#allocation4 + $0x510] sm:$0xff] }
 0x11a   :  { %1740 = vmatprep.subr.mxu1 %v1419_v7  ;;  %v1438_v7 = vld [vmem:[#allocation4 + $0x540] sm:$0xff]  ;;  %v1431_v14 = vld [vmem:[#allocation4 + $0x508] sm:$0xff]  ;;  %v2836_v20 = vld [vmem:[%s3775_s5 + $0x2f8] sm:$0xff] }
 0x11b   :  { %1741 = vmatpush1.msra.mxu1 %v1418_v11  ;;  %v1434_v11 = vld [vmem:[#allocation4 + $0x520] sm:$0xff]  ;;  %v2820_v21 = vld [vmem:[%s3775_s5 + $0x278] sm:$0xff]  ;;  %v2835_v22 = vld [vmem:[%s3775_s5 + $0x2f0] sm:$0xff] }
 0x11c   :  { %1742 = vmatprep.subr.mxu1 %v1417_v15  ;;  %v1430_v15 = vld [vmem:[#allocation4 + $0x500] sm:$0xff]  ;;  %v2816_v26 = vld [vmem:[%s3775_s5 + $0x258] sm:$0xff] }
 0x11d   :  { %1743 = vmatpush1.msra.mxu1 %v1416_v23  ;;  %v2833_v23 = vld [vmem:[%s3775_s5 + $0x2e0] sm:$0xff]  ;;  %v2804_v28 = vld [vmem:[%s3775_s5 + $0x1f8] sm:$0xff] }
 0x11e   :  { %1744 = vmatprep.subr.mxu1 %v1415_v25  ;;  %v2817_v24 = vld [vmem:[%s3775_s5 + $0x260] sm:$0xff]  ;;  %v2832_v25 = vld [vmem:[%s3775_s5 + $0x2d8] sm:$0xff]  ;;  %2843 = vmatprep.subr.mxu0 %v2804_v28 }
 0x11f   :  { %1745 = vmatpush1.msra.mxu1 %v1414_v27  ;;  %v2831_v27 = vld [vmem:[%s3775_s5 + $0x2d0] sm:$0xff] }
 0x120   :  { %1746 = vmatprep.subr.mxu1 %v1413_v29  ;;  %v2815_v29 = vld [vmem:[%s3775_s5 + $0x250] sm:$0xff] }
 0x121   :  { %1747 = vmatpush1.msra.mxu1 %v1412_v30  ;;  %v2788_v30 = vld [vmem:[%s3775_s5 + $0x178] sm:$0xff] }
 0x122   :  { %1748 = vmatprep.subr.mxu1 %v1411_v31  ;;  %v2830_v31 = vld [vmem:[%s3775_s5 + $0x2c8] sm:$0xff]  ;;  %2844 = vmatpush3.msra.mxu0 %v2788_v30 }
 0x123   :  { %1749 = vmatpush1.msra.mxu1 %v1410_v32  ;;  %v2803_v32 = vld [vmem:[%s3775_s5 + $0x1f0] sm:$0xff] }
 0x124   :  { %1750 = vmatprep.subr.mxu1 %v1409_v33  ;;  %v2787_v33 = vld [vmem:[%s3775_s5 + $0x170] sm:$0xff]  ;;  %2845 = vmatprep.subr.mxu0 %v2803_v32 }
 0x125   :  { %1751 = vmatpush1.msra.mxu1 %v1408_v34  ;;  %v2814_v34 = vld [vmem:[%s3775_s5 + $0x248] sm:$0xff]  ;;  %2846 = vmatpush3.msra.mxu0 %v2787_v33 }
 0x126   :  { %1752 = vmatprep.subr.mxu1 %v1407_v38  ;;  %v2802_v38 = vld [vmem:[%s3775_s5 + $0x1e8] sm:$0xff] }
 0x127   :  { %1753 = vmatpush1.msra.mxu1 %v1406_v41  ;;  %v2829_v41 = vld [vmem:[%s3775_s5 + $0x2c0] sm:$0xff]  ;;  %2847 = vmatprep.subr.mxu0 %v2802_v38 }
 0x128   :  { %1754 = vmatprep.subr.mxu1 %v1405_v18  ;;  %v2786_v18 = vld [vmem:[%s3775_s5 + $0x168] sm:$0xff] }
 0x129   :  { %1755 = vmatpush1.msra.mxu1 %v1404_v42  ;;  %v2801_v42 = vld [vmem:[%s3775_s5 + $0x1e0] sm:$0xff]  ;;  %2848 = vmatpush3.msra.mxu0 %v2786_v18 }
 0x12a   :  { %1756 = vmatprep.subr.mxu1 %v1403_v43  ;;  %v2813_v43 = vld [vmem:[%s3775_s5 + $0x240] sm:$0xff]  ;;  %2849 = vmatprep.subr.mxu0 %v2801_v42 }
 0x12b   :  { %1757 = vmatpush1.msra.mxu1 %v1402_v45  ;;  %v2785_v45 = vld [vmem:[%s3775_s5 + $0x160] sm:$0xff] }
 0x12c   :  { %1758 = vmatprep.subr.mxu1 %v1401_v48  ;;  %v2828_v48 = vld [vmem:[%s3775_s5 + $0x2b8] sm:$0xff]  ;;  %2850 = vmatpush3.msra.mxu0 %v2785_v45 }
 0x12d   :  { %1759 = vmatpush1.msra.mxu1 %v1400_v49  ;;  %v2812_v49 = vld [vmem:[%s3775_s5 + $0x238] sm:$0xff] }
 0x12e   :  { %1760 = vmatprep.subr.mxu1 %v1399_v50  ;;  %v2827_v50 = vld [vmem:[%s3775_s5 + $0x2b0] sm:$0xff] }
 0x12f   :  { %1761 = vmatpush1.msra.mxu1 %v1398_v52  ;;  %v2811_v52 = vld [vmem:[%s3775_s5 + $0x230] sm:$0xff] }
 0x130   :  { %1762 = vmatprep.subr.mxu1 %v1461_v46  ;;  %v2826_v46 = vld [vmem:[%s3775_s5 + $0x2a8] sm:$0xff] }
 0x131   :  { %1763 = vmatpush2.msra.mxu1 %v1460_v53  ;;  %v2810_v53 = vld [vmem:[%s3775_s5 + $0x228] sm:$0xff] }
 0x132   :  { %1764 = vmatprep.subr.mxu1 %v1459_v44  ;;  %v2825_v44 = vld [vmem:[%s3775_s5 + $0x2a0] sm:$0xff] }
 0x133   :  { %1765 = vmatpush2.msra.mxu1 %v1458_v47  ;;  %v2809_v47 = vld [vmem:[%s3775_s5 + $0x220] sm:$0xff] }
 0x134   :  { %1766 = vmatprep.subr.mxu1 %v1457_v55  ;;  %v2824_v55 = vld [vmem:[%s3775_s5 + $0x298] sm:$0xff] }
 0x135   :  { %1767 = vmatpush2.msra.mxu1 %v1456_v57  ;;  %v2808_v57 = vld [vmem:[%s3775_s5 + $0x218] sm:$0xff] }
 0x136   :  { %1768 = vmatprep.subr.mxu1 %v1455_v58  ;;  %v2823_v58 = vld [vmem:[%s3775_s5 + $0x290] sm:$0xff] }
 0x137   :  { %1769 = vmatpush2.msra.mxu1 %v1454_v59  ;;  %v2807_v59 = vld [vmem:[%s3775_s5 + $0x210] sm:$0xff] }
 0x138   :  { %1770 = vmatprep.subr.mxu1 %v1453_v60  ;;  %v2822_v60 = vld [vmem:[%s3775_s5 + $0x288] sm:$0xff] }
 0x139   :  { %1771 = vmatpush2.msra.mxu1 %v1452_v35  ;;  %v2806_v35 = vld [vmem:[%s3775_s5 + $0x208] sm:$0xff] }
 0x13a   :  { %1772 = vmatprep.subr.mxu1 %v1451_v61  ;;  %v2800_v61 = vld [vmem:[%s3775_s5 + $0x1d8] sm:$0xff] }
 0x13b   :  { %1773 = vmatpush2.msra.mxu1 %v1450_v62  ;;  %v2821_v62 = vld [vmem:[%s3775_s5 + $0x280] sm:$0xff]  ;;  %2851 = vmatprep.subr.mxu0 %v2800_v61 }
 0x13c   :  { %1774 = vmatprep.subr.mxu1 %v1449_v51  ;;  %v2805_v51 = vld [vmem:[%s3775_s5 + $0x200] sm:$0xff] }
 0x13d   :  { %1775 = vmatpush2.msra.mxu1 %v1448_v63  ;;  %v2784_v63 = vld [vmem:[%s3775_s5 + $0x158] sm:$0xff] }
 0x13e   :  { %1776 = vmatprep.subr.mxu1 %v1447_v0  ;;  %2852 = vmatpush3.msra.mxu0 %v2784_v63  ;;  %v2799_v0 = vld [vmem:[%s3775_s5 + $0x1d0] sm:$0xff] }
 0x13f   :  { %1777 = vmatpush2.msra.mxu1 %v1446_v1  ;;  %v2783_v1 = vld [vmem:[%s3775_s5 + $0x150] sm:$0xff]  ;;  %2853 = vmatprep.subr.mxu0 %v2799_v0 }
 0x140   :  { %1778 = vmatprep.subr.mxu1 %v1445_v2  ;;  %v2798_v2 = vld [vmem:[%s3775_s5 + $0x1c8] sm:$0xff]  ;;  %2854 = vmatpush3.msra.mxu0 %v2783_v1 }
 0x141   :  { %1779 = vmatpush2.msra.mxu1 %v1444_v3  ;;  %2855 = vmatprep.subr.mxu0 %v2798_v2  ;;  %v2782_v3 = vld [vmem:[%s3775_s5 + $0x148] sm:$0xff] }
 0x142   :  { %1780 = vmatprep.subr.mxu1 %v1443_v36  ;;  %v2797_v36 = vld [vmem:[%s3775_s5 + $0x1c0] sm:$0xff]  ;;  %2856 = vmatpush3.msra.mxu0 %v2782_v3 }
 0x143   :  { %1781 = vmatpush2.msra.mxu1 %v1442_v56  ;;  %v2781_v56 = vld [vmem:[%s3775_s5 + $0x140] sm:$0xff]  ;;  %2857 = vmatprep.subr.mxu0 %v2797_v36 }
 0x144   :  { %1782 = vmatprep.subr.mxu1 %v1441_v4  ;;  %v2796_v4 = vld [vmem:[%s3775_s5 + $0x1b8] sm:$0xff]  ;;  %2858 = vmatpush3.msra.mxu0 %v2781_v56 }
 0x145   :  { %1783 = vmatpush2.msra.mxu1 %v1440_v5  ;;  %v2780_v5 = vld [vmem:[%s3775_s5 + $0x138] sm:$0xff]  ;;  %2859 = vmatprep.subr.mxu0 %v2796_v4 }
 0x146   :  { %1784 = vmatprep.subr.mxu1 %v1439_v6  ;;  %v2795_v6 = vld [vmem:[%s3775_s5 + $0x1b0] sm:$0xff]  ;;  %2860 = vmatpush3.msra.mxu0 %v2780_v5 }
 0x147   :  { %1785 = vmatpush2.msra.mxu1 %v1438_v7  ;;  %v2779_v7 = vld [vmem:[%s3775_s5 + $0x130] sm:$0xff]  ;;  %2861 = vmatprep.subr.mxu0 %v2795_v6 }
 0x148   :  { %1786 = vmatprep.subr.mxu1 %v1437_v8  ;;  %v2794_v8 = vld [vmem:[%s3775_s5 + $0x1a8] sm:$0xff]  ;;  %2862 = vmatpush3.msra.mxu0 %v2779_v7 }
 0x149   :  { %1787 = vmatpush2.msra.mxu1 %v1436_v9  ;;  %v2778_v9 = vld [vmem:[%s3775_s5 + $0x128] sm:$0xff]  ;;  %2863 = vmatprep.subr.mxu0 %v2794_v8 }
 0x14a   :  { %1788 = vmatprep.subr.mxu1 %v1435_v10  ;;  %v2793_v10 = vld [vmem:[%s3775_s5 + $0x1a0] sm:$0xff]  ;;  %2864 = vmatpush3.msra.mxu0 %v2778_v9 }
 0x14b   :  { %1789 = vmatpush2.msra.mxu1 %v1434_v11  ;;  %v2777_v11 = vld [vmem:[%s3775_s5 + $0x120] sm:$0xff]  ;;  %2865 = vmatprep.subr.mxu0 %v2793_v10 }
 0x14c   :  { %1790 = vmatprep.subr.mxu1 %v1433_v12  ;;  %v2792_v12 = vld [vmem:[%s3775_s5 + $0x198] sm:$0xff]  ;;  %2866 = vmatpush3.msra.mxu0 %v2777_v11 }
 0x14d   :  { %1791 = vmatpush2.msra.mxu1 %v1432_v13  ;;  %v2776_v13 = vld [vmem:[%s3775_s5 + $0x118] sm:$0xff]  ;;  %2867 = vmatprep.subr.mxu0 %v2792_v12 }
 0x14e   :  { %1792 = vmatprep.subr.mxu1 %v1431_v14  ;;  %v2791_v14 = vld [vmem:[%s3775_s5 + $0x190] sm:$0xff]  ;;  %2868 = vmatpush3.msra.mxu0 %v2776_v13 }
 0x14f   :  { %1793 = vmatpush2.msra.mxu1 %v1430_v15  ;;  %v2775_v15 = vld [vmem:[%s3775_s5 + $0x110] sm:$0xff]  ;;  %2869 = vmatprep.subr.mxu0 %v2791_v14 }
 0x150   :  { %1795 = vmatmul.mubr.f32.vlgmr.msra.gmra.mxu1 %v3308_v19  ;;  %2919 = vmatprep.subr.mxu1 %v2836_v20  ;;  %v2819_v19 = vld [vmem:[%s3775_s5 + $0x270] sm:$0xff]  ;;  %v2790_v20 = vld [vmem:[%s3775_s5 + $0x188] sm:$0xff] }
 0x151   :  { %1800 = vmatprep.mubr.f32.mxu1 %v3335_v16  ;;  %2920 = vmatpush3.msra.mxu1 %v2820_v21  ;;  %v2834_v16 = vld [vmem:[%s3775_s5 + $0x2e8] sm:$0xff] }
 0x152   :  { %2921 = vmatprep.subr.mxu1 %v2835_v22  ;;  %2870 = vmatpush3.msra.mxu0 %v2775_v15  ;;  %v2774_v21 = vld [vmem:[%s3775_s5 + $0x108] sm:$0xff]  ;;  %v2789_v22 = vld [vmem:[%s3775_s5 + $0x180] sm:$0xff] }
 0x153   :  { %2922 = vmatpush3.msra.mxu1 %v2819_v19  ;;  %2871 = vmatprep.subr.mxu0 %v2790_v20  ;;  %v2773_v19 = vld [vmem:[%s3775_s5 + $0x100] sm:$0xff] }
 0x154   :  { %1801 = vmatmul.mubr.f32.gmra.mxu1 %v3337_v17  ;;  %v2818_v17 = vld [vmem:[%s3775_s5 + $0x268] sm:$0xff]  ;;  %2923 = vmatprep.subr.mxu1 %v2834_v16  ;;  %v2117_v16 = vld [vmem:[%s3775_s5 + $0xf8] sm:$0xff] }
 0x155   :  { %2924 = vmatpush3.msra.mxu1 %v2818_v17  ;;  %2872 = vmatpush3.msra.mxu0 %v2774_v21  ;;  %v1177_v17 = vld [vmem:[%s3774_s4] sm:$0x3] }
 0x156   :  { %2925 = vmatprep.subr.mxu1 %v2833_v23  ;;  %2873 = vmatprep.subr.mxu0 %v2789_v22  ;;  %v3548_v23 = vrot.slane %v1177_v17, %v3189_v37 }
 0x157   :  { %2926 = vmatpush3.msra.mxu1 %v2817_v24  ;;  %2874 = vmatpush3.msra.mxu0 %v2773_v19  ;;  %v3551_v24 = vrot.slane %v1177_v17, %v3195_v39 }
 0x158   :  { %2927 = vmatprep.subr.mxu1 %v2832_v25  ;;  %2881 = vmatprep.subr.mxu0 %v2117_v16 }
 0x159   :  { %2928 = vmatpush3.msra.mxu1 %v2816_v26 }
 0x15a   :  { %2929 = vmatprep.subr.mxu1 %v2831_v27 }
 0x15b   :  { %2930 = vmatpush3.msra.mxu1 %v2815_v29 }
 0x15c   :  { %2931 = vmatprep.subr.mxu1 %v2830_v31 }
 0x15d   :  { %2932 = vmatpush3.msra.mxu1 %v2814_v34 }
 0x15e   :  { %2933 = vmatprep.subr.mxu1 %v2829_v41 }
 0x15f   :  { %2934 = vmatpush3.msra.mxu1 %v2813_v43 }
 0x160   :  { %2935 = vmatprep.subr.mxu1 %v2828_v48 }
 0x161   :  { %2936 = vmatpush3.msra.mxu1 %v2812_v49 }
 0x162   :  { %2937 = vmatprep.subr.mxu1 %v2827_v50 }
 0x163   :  { %2938 = vmatpush3.msra.mxu1 %v2811_v52 }
 0x164   :  { %2939 = vmatprep.subr.mxu1 %v2826_v46 }
 0x165   :  { %2940 = vmatpush3.msra.mxu1 %v2810_v53 }
 0x166   :  { %2941 = vmatprep.subr.mxu1 %v2825_v44 }
 0x167   :  { %2942 = vmatpush3.msra.mxu1 %v2809_v47 }
 0x168   :  { %2943 = vmatprep.subr.mxu1 %v2824_v55 }
 0x169   :  { %2944 = vmatpush3.msra.mxu1 %v2808_v57 }
 0x16a   :  { %2945 = vmatprep.subr.mxu1 %v2823_v58 }
 0x16b   :  { %2946 = vmatpush3.msra.mxu1 %v2807_v59 }
 0x16c   :  { %2947 = vmatprep.subr.mxu1 %v2822_v60 }
 0x16d   :  { %2948 = vmatpush3.msra.mxu1 %v2806_v35 }
 0x16e   :  { %2949 = vmatprep.subr.mxu1 %v2821_v62 }
 0x16f   :  { %2950 = vmatpush3.msra.mxu1 %v2805_v51 }
 0x1d0   :  { %v1382_v25 = vpop.f32.mrf.mxu1 }
 0x1d1   :  { %v1383_v26 = vadd.f32 %v1382_v25, %v3548_v23 }
 0x1d2   :  { %v1384_v27 = vpop.f32.mrf.mxu1 }
 0x1d3   :  { %v1385_v28 = vadd.f32 %v1384_v27, %v3551_v24  ;;  %v3555_v29 = vmax.f32 %v1383_v26, 0.0 }
 0x1d5   :  { %v3557_v30 = vmax.f32 %v1385_v28, 0.0 }
 0x1d6   :  { %v1388_v48 = vpop.f32.mrf.mxu1 }
 0x1d7   :  { %v1819_v31 = vcombine.low %v3555_v29, %v3557_v30  ;;  %v1820_v37 = vcombine.high %v3555_v29, %v3557_v30  ;;  %v1389_v49 = vadd.f32 %v1388_v48, %v3548_v23 }
 0x1d8   :  { %v1390_v52 = vpop.f32.mrf.mxu1 }
 0x1d9   :  { %v1827_v32 = vrot.slane %v1819_v31, %v3205_v54  ;;  %v1834_v39 = vrot.slane %v1820_v37, %v3205_v54  ;;  %v1391_v46 = vadd.f32 %v1390_v52, %v3551_v24  ;;  %v3583_v53 = vmax.f32 %v1389_v49, 0.0 }
 0x1db   :  { %v1835_v33 = vcombine.high %v1827_v32, %v1827_v32  ;;  %v1836_v34 = vcombine.high %v1834_v39, %v1834_v39  ;;  %v1843_v38 = vrot.slane %v1827_v32, %v3205_v54  ;;  %v1850_v41 = vrot.slane %v1834_v39, %v3205_v54 }
 0x1dc   :  { %v3585_v44 = vmax.f32 %v1391_v46, 0.0 }
 0x1dd   :  { %v1857_v18 = vrot.slane %v1835_v33, %v3205_v54  ;;  %v1864_v42 = vrot.slane %v1836_v34, %v3205_v54  ;;  %v1865_v43 = vcombine.high %v1843_v38, %v1843_v38  ;;  %v1866_v45 = vcombine.high %v1850_v41, %v1850_v41  ;;  %1955 = vst.msk [vmem:[#allocation3 + $0x4] ss:$8 sm:$0x3] %vm3169_vm1, %v1850_v41 }
 0x1de   :  { %v1869_v47 = vcombine.low %v3583_v53, %v3585_v44  ;;  %v1870_v55 = vcombine.high %v3583_v53, %v3585_v44 }
 0x1df   :  { %v1867_v50 = vcombine.high %v1857_v18, %v1857_v18  ;;  %1937 = vst.msk [vmem:[#allocation3 + $0x1] ss:$8 sm:$0x3] %vm3169_vm1, %v1857_v18  ;;  %1943 = vst.msk [vmem:[#allocation3 + $0x2] ss:$8 sm:$0x3] %vm3169_vm1, %v1865_v43 }
 0x1e0   :  { %1961 = vst.msk [vmem:[#allocation3 + $0x5] ss:$8 sm:$0x3] %vm3169_vm1, %v1864_v42  ;;  %1967 = vst.msk [vmem:[#allocation3 + $0x6] ss:$8 sm:$0x3] %vm3169_vm1, %v1866_v45  ;;  %v1877_v57 = vrot.slane %v1869_v47, %v3205_v54  ;;  %v1884_v58 = vrot.slane %v1870_v55, %v3205_v54 }
 0x1e1   :  { %1949 = vst.msk [vmem:[#allocation3 + $0x3] ss:$8 sm:$0x3] %vm3169_vm1, %v1867_v50 }
 0x1e2   :  { %v1885_v59 = vcombine.high %v1877_v57, %v1877_v57  ;;  %v1886_v60 = vcombine.high %v1884_v58, %v1884_v58  ;;  %v1893_v35 = vrot.slane %v1877_v57, %v3205_v54  ;;  %v1900_v61 = vrot.slane %v1884_v58, %v3205_v54 }
 0x1e4   :  { %v1907_v51 = vrot.slane %v1885_v59, %v3205_v54  ;;  %v1914_v63 = vrot.slane %v1886_v60, %v3205_v54  ;;  %v1915_v0 = vcombine.high %v1893_v35, %v1893_v35  ;;  %1940 = vst.msk [vmem:[#allocation3 + $0x11] ss:$8 sm:$0x3] %vm3169_vm1, %v1893_v35  ;;  %1964 = vst.msk [vmem:[#allocation3 + $0x15] ss:$8 sm:$0x3] %vm3169_vm1, %v1900_v61 }
 0x1e6   :  { %v1916_v2 = vcombine.high %v1907_v51, %v1907_v51  ;;  %1946 = vst.msk [vmem:[#allocation3 + $0x12] ss:$8 sm:$0x3] %vm3169_vm1, %v1907_v51  ;;  %1952 = vst.msk [vmem:[#allocation3 + $0x13] ss:$8 sm:$0x3] %vm3169_vm1, %v1915_v0  ;;  %v1719_v0 = vpop.f32.mrf.mxu0 }
 0x1e7   :  { %1970 = vst.msk [vmem:[#allocation3 + $0x16] ss:$8 sm:$0x3] %vm3169_vm1, %v1914_v63  ;;  %v2976_v3 = vld [vmem:[#allocation3 + $0x4] ss:$8 sps:$4 sm:$0xff]  }
 0x1e8   :  { %v2974_v62 = vld [vmem:[#allocation3] ss:$8 sps:$4 sm:$0xee]   ;;  %1958 = vst.msk [vmem:[#allocation3 + $0x14] ss:$8 sm:$0x3] %vm3169_vm1, %v1916_v2  ;;  %v2001_v4 = vrot.slane %v2976_v3, %v3205_v54  ;;  %v1721_v2 = vpop.f32.mrf.mxu0 }
 0x1e9   :  { %v1994_v1 = vrot.slane %v2974_v62, %v3205_v54 }
 0x1ea   :  { %v2003_v7 = vcombine.high %v2001_v4, %v2001_v4  ;;  %v2017_v8 = vrot.slane %v2001_v4, %v3205_v54 }
 0x1eb   :  { %v2002_v36 = vcombine.high %v1994_v1, %v1994_v1  ;;  %v2010_v5 = vrot.slane %v1994_v1, %v3205_v54 }
 0x1ec   :  { %v2031_v14 = vrot.slane %v2003_v7, %v3205_v54  ;;  %v2033_v40 = vcombine.high %v2017_v8, %v2017_v8 }
 0x1ed   :  { %v2024_v56 = vrot.slane %v2002_v36, %v3205_v54  ;;  %v2032_v9 = vcombine.high %v2010_v5, %v2010_v5  ;;  %v2977_v11 = vld [vmem:[#allocation3 + $0x10] ss:$8 sps:$4 sm:$0xee]  }
 0x1ee   :  { %v2044_v15 = vrot.slane %v2977_v11, %v3205_v54  ;;  %v2035_v25 = vcombine.high %v2031_v14, %v2031_v14  ;;  %v2336_v27 = vcombine.low %v2031_v14, %v2033_v40 }
 0x1ef   :  { %v2034_v6 = vcombine.high %v2024_v56, %v2024_v56  ;;  %v2979_v10 = vld [vmem:[#allocation3 + $0x14] ss:$8 sps:$4 sm:$0xff]   ;;  %v2334_v20 = vcombine.low %v2024_v56, %v2032_v9  ;;  %v1725_v56 = vpop.f32.mrf.mxu0 }
 0x1f0   :  { %v2051_v13 = vrot.slane %v2979_v10, %v3205_v54  ;;  %v2052_v22 = vcombine.high %v2044_v15, %v2044_v15  ;;  %v2060_v28 = vrot.slane %v2044_v15, %v3205_v54  ;;  %v2358_v42 = vrot.slane %v2336_v27, %v3205_v54  ;;  %v2101_v15 = vld [vmem:[%s3775_s5 + $0x78] sm:$0xff] }
 0x1f1   :  { %v2335_v12 = vcombine.low %v2034_v6, %v2017_v8  ;;  %v2344_v31 = vrot.slane %v2334_v20, %v3205_v54  ;;  %v1727_v10 = vpop.f32.mrf.mxu0  ;;  %v2097_v27 = vld [vmem:[%s3775_s5 + $0x58] sm:$0xff] }
 0x1f2   :  { %v2053_v21 = vcombine.high %v2051_v13, %v2051_v13  ;;  %v2067_v16 = vrot.slane %v2051_v13, %v3205_v54  ;;  %v2074_v26 = vrot.slane %v2052_v22, %v3205_v54  ;;  %v2100_v22 = vld [vmem:[%s3775_s5 + $0x70] sm:$0xff] }
 0x1f3   :  { %v2351_v19 = vrot.slane %v2335_v12, %v3205_v54 }
 0x1f4   :  { %v2081_v17 = vrot.slane %v2053_v21, %v3205_v54  ;;  %v2337_v39 = vcombine.low %v2035_v25, %v2074_v26  ;;  %v2837_v33 = vcombine.high %v2060_v28, %v2074_v26  ;;  %v2116_v21 = vld [vmem:[%s3775_s5 + $0xf0] sm:$0xff]  ;;  %v2098_v25 = vld [vmem:[%s3775_s5 + $0x60] sm:$0xff]  ;;  %v2113_v26 = vld [vmem:[%s3775_s5 + $0xd8] sm:$0xff] }
 0x1f5   :  { %v2366_v34 = vcombine.low %v2344_v31, %v2351_v19  ;;  %v2367_v38 = vcombine.high %v2344_v31, %v2351_v19  ;;  %v2112_v28 = vld [vmem:[%s3775_s5 + $0xd0] sm:$0xff] }
 0x1f6   :  { %v2401_v37 = vcombine.low %v2067_v16, %v2081_v17  ;;  %v2838_v32 = vcombine.high %v2067_v16, %v2081_v17  ;;  %v2365_v43 = vrot.slane %v2337_v39, %v3205_v54  ;;  %v2409_v45 = vrot.slane %v2837_v33, %v3205_v54  ;;  %v2114_v17 = vld [vmem:[%s3775_s5 + $0xe0] sm:$0xff]  ;;  %v2096_v31 = vld [vmem:[%s3775_s5 + $0x50] sm:$0xff]  ;;  %v2109_v33 = vld [vmem:[%s3775_s5 + $0xb8] sm:$0xff] }
 0x1f7   :  { %v2383_v46 = vrot.slane %v2367_v38, %v3205_v54  ;;  %v2376_v47 = vrot.slane %v2366_v34, %v3205_v54  ;;  %v2094_v39 = vld [vmem:[%s3775_s5 + $0x40] sm:$0xff]  ;;  %v2093_v34 = vld [vmem:[%s3775_s5 + $0x38] sm:$0xff]  ;;  %v2108_v38 = vld [vmem:[%s3775_s5 + $0xb0] sm:$0xff] }
 0x1f8   :  { %v2416_v41 = vrot.slane %v2401_v37, %v3205_v54  ;;  %v2423_v18 = vrot.slane %v2838_v32, %v3205_v54  ;;  %v2368_v49 = vcombine.low %v2358_v42, %v2365_v43  ;;  %v2369_v50 = vcombine.high %v2358_v42, %v2365_v43  ;;  %v2095_v37 = vld [vmem:[%s3775_s5 + $0x48] sm:$0xff]  ;;  %v2110_v32 = vld [vmem:[%s3775_s5 + $0xc0] sm:$0xff] }
 0x1f9   :  { %v2091_v42 = vld [vmem:[%s3775_s5 + $0x28] sm:$0xff]  ;;  %v2106_v43 = vld [vmem:[%s3775_s5 + $0xa0] sm:$0xff] }
 0x1fa   :  { %v2426_v48 = vcombine.high %v2423_v18, %v2423_v18  ;;  %v2425_v52 = vcombine.high %v2409_v45, %v2416_v41  ;;  %v2424_v55 = vcombine.low %v2409_v45, %v2416_v41  ;;  %v2397_v57 = vrot.slane %v2369_v50, %v3205_v54  ;;  %v2092_v41 = vld [vmem:[%s3775_s5 + $0x30] sm:$0xff]  ;;  %v2090_v45 = vld [vmem:[%s3775_s5 + $0x20] sm:$0xff] }
 0x1fb   :  { %v2390_v58 = vrot.slane %v2368_v49, %v3205_v54  ;;  %v2447_v63 = vrot.slane %v2423_v18, %v3205_v54  ;;  %v2107_v18 = vld [vmem:[%s3775_s5 + $0xa8] sm:$0xff]  ;;  %v2089_v49 = vld [vmem:[%s3775_s5 + $0x18] sm:$0xff]  ;;  %v2104_v50 = vld [vmem:[%s3775_s5 + $0x90] sm:$0xff] }
 0x1fc   :  { %v2440_v59 = vrot.slane %v2425_v52, %v3205_v54  ;;  %v2454_v60 = vrot.slane %v2426_v48, %v3205_v54  ;;  %v2399_v35 = vcombine.low %v2383_v46, %v2397_v57  ;;  %v2433_v62 = vrot.slane %v2424_v55, %v3205_v54  ;;  %v2105_v48 = vld [vmem:[%s3775_s5 + $0x98] sm:$0xff]  ;;  %v2088_v52 = vld [vmem:[%s3775_s5 + $0x10] sm:$0xff]  ;;  %v2103_v46 = vld [vmem:[%s3775_s5 + $0x88] sm:$0xff] }
 0x1fd   :  { %v2398_v61 = vcombine.low %v2376_v47, %v2390_v58  ;;  %v2087_v47 = vld [vmem:[%s3775_s5 + $0x8] sm:$0xff]  ;;  %v2102_v55 = vld [vmem:[%s3775_s5 + $0x80] sm:$0xff] }
 0x1fe   :  { %2525 = vmatprep.mubr.f32.mxu1 %v2399_v35  ;;  %v2456_v51 = vcombine.low %v2440_v59, %v2454_v60  ;;  %v2455_v1 = vcombine.low %v2433_v62, %v2447_v63  ;;  %v2086_v57 = vld [vmem:[%s3775_s5] sm:$0xff] }
 0x1ff   :  { %2526 = vmatmul.mubr.f32.vlgmr.msra.gmra.mxu1 %v2398_v61 }
 0x200   :  { %2530 = vmatprep.mubr.f32.mxu1 %v2456_v51 }
 0x203   :  { %2531 = vmatmul.mubr.f32.gmra.mxu1 %v2455_v1 }
 0x210   :  { %v1796_v3 = vpop.f32.mrf.mxu1 }
 0x211   :  { %v1797_v36 = vadd.f32 %v1796_v3, %v1719_v0 }
 0x212   :  { %v1798_v4 = vpop.f32.mrf.mxu1 }
 0x213   :  { %v1799_v5 = vadd.f32 %v1798_v4, %v1721_v2  ;;  %v1807_v6 = vadd.f32 %v1797_v36, %v3548_v23 }
 0x214   :  { %v1802_v7 = vpop.f32.mrf.mxu1 }
 0x215   :  { %v1808_v8 = vadd.f32 %v1799_v5, %v3551_v24  ;;  %v1803_v9 = vadd.f32 %v1802_v7, %v1725_v56  ;;  %v1811_v14 = vmax.f32 %v1807_v6, 0.0 }
 0x216   :  { %v1804_v11 = vpop.f32.mrf.mxu1 }
 0x217   :  { %v1812_v12 = vmax.f32 %v1808_v8, 0.0  ;;  %v1805_v13 = vadd.f32 %v1804_v11, %v1727_v10  ;;  %v1809_v40 = vadd.f32 %v1803_v9, %v3548_v23  ;;  %v2115_v23 = vld [vmem:[%s3775_s5 + $0xe8] sm:$0xff] }
 0x219   :  { %v1810_v20 = vadd.f32 %v1805_v13, %v3551_v24  ;;  %2215 = vmatprep.mubr.f32.mxu0 %v1812_v12  ;;  %v1813_v16 = vmax.f32 %v1809_v40, 0.0  ;;  %v2099_v24 = vld [vmem:[%s3775_s5 + $0x68] sm:$0xff] }
 0x21a   :  { %2216 = vmatmul.mubr.f32.vlgmr.msra.gmra.mxu0 %v1811_v14 }
 0x21b   :  { %v1814_v19 = vmax.f32 %v1810_v20, 0.0  ;;  %2882 = vmatpush3.msra.mxu0 %v2101_v15 }
 0x21c   :  { %2883 = vmatprep.subr.mxu0 %v2116_v21 }
 0x21d   :  { %2884 = vmatpush3.msra.mxu0 %v2100_v22  ;;  %2220 = vmatprep.mubr.f32.mxu0 %v1814_v19 }
 0x21e   :  { %2885 = vmatprep.subr.mxu0 %v2115_v23  ;;  %2221 = vmatmul.mubr.f32.gmra.mxu0 %v1813_v16 }
 0x21f   :  { %2886 = vmatpush3.msra.mxu0 %v2099_v24  ;;  %2290 = vmatprep.mubr.f32.mxu0 %v3557_v30  ;;  %v2111_v30 = vld [vmem:[%s3775_s5 + $0xc8] sm:$0xff] }
 0x220   :  { %2887 = vmatprep.subr.mxu0 %v2114_v17 }
 0x221   :  { %2888 = vmatpush3.msra.mxu0 %v2098_v25 }
 0x222   :  { %2889 = vmatprep.subr.mxu0 %v2113_v26 }
 0x223   :  { %2890 = vmatpush3.msra.mxu0 %v2097_v27 }
 0x224   :  { %2891 = vmatprep.subr.mxu0 %v2112_v28 }
 0x225   :  { %2892 = vmatpush3.msra.mxu0 %v2096_v31 }
 0x226   :  { %2893 = vmatprep.subr.mxu0 %v2111_v30 }
 0x227   :  { %2894 = vmatpush3.msra.mxu0 %v2095_v37 }
 0x228   :  { %2895 = vmatprep.subr.mxu0 %v2110_v32 }
 0x229   :  { %2896 = vmatpush3.msra.mxu0 %v2094_v39 }
 0x22a   :  { %2897 = vmatprep.subr.mxu0 %v2109_v33 }
 0x22b   :  { %2898 = vmatpush3.msra.mxu0 %v2093_v34 }
 0x22c   :  { %2899 = vmatprep.subr.mxu0 %v2108_v38 }
 0x22d   :  { %2900 = vmatpush3.msra.mxu0 %v2092_v41 }
 0x22e   :  { %2901 = vmatprep.subr.mxu0 %v2107_v18 }
 0x22f   :  { %2902 = vmatpush3.msra.mxu0 %v2091_v42 }
 0x230   :  { %2903 = vmatprep.subr.mxu0 %v2106_v43 }
 0x231   :  { %2904 = vmatpush3.msra.mxu0 %v2090_v45 }
 0x232   :  { %2905 = vmatprep.subr.mxu0 %v2105_v48 }
 0x233   :  { %2906 = vmatpush3.msra.mxu0 %v2089_v49 }
 0x234   :  { %2907 = vmatprep.subr.mxu0 %v2104_v50 }
 0x235   :  { %2908 = vmatpush3.msra.mxu0 %v2088_v52 }
 0x236   :  { %2909 = vmatprep.subr.mxu0 %v2103_v46 }
 0x237   :  { %2910 = vmatpush3.msra.mxu0 %v2087_v47 }
 0x238   :  { %2911 = vmatprep.subr.mxu0 %v2102_v55 }
 0x239   :  { %2912 = vmatpush3.msra.mxu0 %v2086_v57 }
 0x23a   :  { %2291 = vmatmul.mubr.f32.vlgmr.msra.gmra.mxu0 %v3555_v29  ;;  %v2839_v29 = vld [vmem:[%s3776_s6] ss:$0 sm:$0xff] }
 0x23b   :  { %2295 = vmatprep.mubr.f32.mxu0 %v3585_v44 }
 0x23e   :  { %2296 = vmatmul.mubr.f32.gmra.mxu0 %v3583_v53 }
 0x2bf   :  { %v2951_v60 = vpop.f32.mrf.mxu1 }
 0x2c1   :  { %v2952_v61 = vpop.f32.mrf.mxu1 }
 0x2c2   :  { %v2953_v36 = vadd.f32 %v2952_v61, %v2951_v60 }
 0x2c3   :  { %v2954_v63 = vpop.f32.mrf.mxu1 }
 0x2c5   :  { %v2955_v4 = vpop.f32.mrf.mxu1 }
 0x2c6   :  { %v2956_v7 = vadd.f32 %v2955_v4, %v2954_v63 }
 0x2da   :  { %v2875_v58 = vpop.f32.mrf.mxu0 }
 0x2dc   :  { %v2876_v59 = vpop.f32.mrf.mxu0 }
 0x2dd   :  { %v2877_v1 = vadd.f32 %v2876_v59, %v2875_v58 }
 0x2de   :  { %v2878_v35 = vpop.f32.mrf.mxu0 }
 0x2e0   :  { %v2879_v62 = vpop.f32.mrf.mxu0 }
 0x2e1   :  { %v2880_v44 = vadd.f32 %v2879_v62, %v2878_v35 }
 0x2fa   :  { %v2913_v51 = vpop.f32.mrf.mxu0 }
 0x2fc   :  { %v2914_v0 = vpop.f32.mrf.mxu0 }
 0x2fd   :  { %v2915_v2 = vadd.f32 %v2914_v0, %v2913_v51 }
 0x2fe   :  { %v2916_v3 = vpop.f32.mrf.mxu0 }
 0x2ff   :  { %v2293_v56 = vadd.f32 %v2915_v2, %v2877_v1 }
 0x300   :  { %v2917_v53 = vpop.f32.mrf.mxu0 }
 0x301   :  { %v2536_v5 = vadd.f32 %v2953_v36, %v2293_v56  ;;  %v2918_v6 = vadd.f32 %v2917_v53, %v2916_v3 }
 0x303   :  { %v2545_v8 = vadd.f32 %v2839_v29, %v2536_v5  ;;  %v2298_v9 = vadd.f32 %v2918_v6, %v2880_v44 }
 0x305   :  { %v2840_v10 = vmul.f32 -1.442695, %v2545_v8  ;;  %v2537_v11 = vadd.f32 %v2956_v7, %v2298_v9 }
 0x307   :  { %2980 = vpow2.f32 %v2840_v10  ;;  %v2546_v12 = vadd.f32 %v2839_v29, %v2537_v11 }
 0x309   :  { %v2841_v13 = vmul.f32 -1.442695, %v2546_v12 }
 0x30b   :  { %2982 = vpow2.f32 %v2841_v13 }
 0x314   :  { %v2981_v14 = vpop.eup %2980 }
 0x315   :  { %v2553_v40 = vadd.f32 1.0, %v2981_v14 }
 0x317   :  { %2984 = vrcp.f32 %v2553_v40 }
 0x318   :  { %v2983_v15 = vpop.eup %2982 }
 0x319   :  { %v2554_v20 = vadd.f32 1.0, %v2983_v15 }
 0x31b   :  { %2986 = vrcp.f32 %v2554_v20 }
 0x324   :  { %v2985_v21 = vpop.eup %2984 }
 0x325   :  { %v2561_v22 = vcombine.high %v2985_v21, %v2985_v21  ;;  %v2568_v19 = vrot.slane %v2985_v21, %v3205_v54 }
 0x327   :  { %v2575_v23 = vrot.slane %v2561_v22, %v3205_v54  ;;  %v2576_v16 = vcombine.high %v2568_v19, %v2568_v19  ;;  %v2584_v17 = vrot.slane %v2568_v19, %v3205_v54 }
 0x328   :  { %v2987_v24 = vpop.eup %2986 }
 0x329   :  { %v2577_v25 = vcombine.high %v2575_v23, %v2575_v23  ;;  %v2591_v26 = vrot.slane %v2575_v23, %v3205_v54  ;;  %v2598_v27 = vrot.slane %v2576_v16, %v3205_v54  ;;  %v2610_v28 = vcombine.high %v2987_v24, %v2987_v24 }
 0x32a   :  { %v2617_v31 = vrot.slane %v2987_v24, %v3205_v54 }
 0x32b   :  { %v2605_v30 = vrot.slane %v2577_v25, %v3205_v54  ;;  %v2607_v37 = vcombine.high %v2591_v26, %v2591_v26  ;;  %v2657_v32 = vcombine.low %v2584_v17, %v2598_v27  ;;  %v2842_v39 = vcombine.high %v2584_v17, %v2598_v27 }
 0x32c   :  { %v2624_v33 = vrot.slane %v2610_v28, %v3205_v54  ;;  %v2625_v34 = vcombine.high %v2617_v31, %v2617_v31  ;;  %v2633_v38 = vrot.slane %v2617_v31, %v3205_v54 }
 0x32d   :  { %v2659_v41 = vcombine.low %v2591_v26, %v2605_v30  ;;  %v2666_v18 = vrot.slane %v2657_v32, %v3205_v54  ;;  %v2673_v42 = vrot.slane %v2842_v39, %v3205_v54  ;;  %v2609_v43 = vcombine.high %v2605_v30, %v2605_v30 }
 0x32e   :  { %v2626_v45 = vcombine.high %v2624_v33, %v2624_v33  ;;  %v2647_v48 = vrot.slane %v2625_v34, %v3205_v54  ;;  %v2687_v50 = vrot.slane %v2607_v37, %v3205_v54  ;;  %v2655_v46 = vcombine.high %v2633_v38, %v2633_v38 }
 0x32f   :  { %v2680_v49 = vrot.slane %v2659_v41, %v3205_v54  ;;  %v2688_v52 = vcombine.low %v2666_v18, %v2673_v42  ;;  %v2640_v47 = vrot.slane %v2624_v33, %v3205_v54  ;;  %v2705_v58 = vcombine.low %v2609_v43, %v2633_v38 }
 0x330   :  { %v2654_v55 = vrot.slane %v2626_v45, %v3205_v54  ;;  %v2656_v57 = vcombine.high %v2647_v48, %v2647_v48  ;;  %v2706_v60 = vcombine.low %v2647_v48, %v2655_v46 }
 0x331   :  { %v2689_v59 = vcombine.low %v2680_v49, %v2687_v50  ;;  %v2714_v61 = vrot.slane %v2705_v58, %v3205_v54  ;;  %v2696_v62 = vrot.slane %v2688_v52, %v3205_v54 }
 0x332   :  { %v2707_v35 = vcombine.low %v2656_v57, %v2640_v47  ;;  %v2721_v63 = vrot.slane %v2706_v60, %v3205_v54  ;;  %v2735_v1 = vrot.slane %v2654_v55, %v3205_v54 }
 0x333   :  { %v2703_v51 = vrot.slane %v2689_v59, %v3205_v54 }
 0x334   :  { %v2728_v0 = vrot.slane %v2707_v35, %v3205_v54  ;;  %v2736_v3 = vcombine.low %v2714_v61, %v2721_v63 }
 0x335   :  { %v2704_v2 = vcombine.low %v2696_v62, %v2703_v51 }
 0x336   :  { %v2737_v36 = vcombine.low %v2728_v0, %v2735_v1  ;;  %v2744_v56 = vrot.slane %v2736_v3, %v3205_v54 }
 0x337   :  { %2756 = vst.msk [vmem:[%s3777_s7] sm:$0x7f] %vm2755_vm2, %v2704_v2 }
 0x338   :  { %v2751_v4 = vrot.slane %v2737_v36, %v3205_v54 }
 0x33a   :  { %v2752_v29 = vcombine.low %v2744_v56, %v2751_v4 }
 0x33c   :  { %2757 = vst.msk [vmem:[%s3777_s7 + $0x8] sm:$0x7f] %vm2755_vm2, %v2752_v29 }
 0x33d   :  { %2762 = vsyncpa [#allocation5], 1 }

</bundles_post_ra>
